<compile_context>
chip_gen: v7x
topology: tpu7x:2x2x1
jax: 0.10.0
libtpu: 0.0.40
codegen_flags: <defaults>
</compile_context>

<pallas_src>
import jax
import jax.numpy as jnp
from jax.experimental import pallas as pl
from jax.experimental.pallas import tpu as pltpu

# --- module hyperparameters (consistent with the PyTorch __init__) -----------
CNN_embed_dim = 32       # RNN_input_size
RNN_hidden_layers = 2    # h_RNN_layers
RNN_hidden_nodes = 32    # h_RNN
FC_dim = 16              # h_FC_dim
dropout_p = 0.3          # drop_p (identity in eval mode)
NUM_CLASSES = 2

BATCH = 2
SEQ = 8


# ------------------------- fused Pallas kernel --------------------------------
def _lstm_cell(gx_t, h, c, whh_t, H):
    """One LSTM cell step. gx_t = x_t @ Wih^T + (b_ih+b_hh) is precomputed."""
    gates = gx_t + jnp.dot(h, whh_t, preferred_element_type=jnp.float32)  # (B, 4H)
    # transcendentals on the full (B, 4H) register, slice afterwards
    sg = jax.nn.sigmoid(gates)
    tg = jnp.tanh(gates)
    i = sg[:, 0 * H:1 * H]
    f = sg[:, 1 * H:2 * H]
    g = tg[:, 2 * H:3 * H]
    o = sg[:, 3 * H:4 * H]
    c_new = f * c + i * g
    h_new = o * jnp.tanh(c_new)
    return h_new, c_new


def decoder_fused_kernel(x_ref, wih1_ref, whh1_ref, b1_ref,
                         wih2_ref, whh2_ref, b2_ref,
                         fc1w_ref, fc1b_ref, fc2w_ref, fc2b_ref,
                         out_ref, h1_seq_ref):
    """Single-invocation kernel: LSTM layer 1 -> LSTM layer 2 -> fc1 -> fc2."""
    B, T, D = x_ref.shape
    H = whh1_ref.shape[0]

    # ---- layer 1: hoisted input projection (one MXU call for all timesteps) --
    x2d = x_ref[...].reshape(B * T, D)                       # rows in (b, t) order
    gx1 = (jnp.dot(x2d, wih1_ref[...], preferred_element_type=jnp.float32)
           + b1_ref[...])                                    # (B*T, 4H)
    gx1 = gx1.reshape(B, T, 4 * H)                           # layout-compatible split

    whh1 = whh1_ref[...]
    h = jnp.zeros((B, H), jnp.float32)
    c = jnp.zeros((B, H), jnp.float32)
    for t in range(T):                                       # fully unrolled (T=8)
        h, c = _lstm_cell(gx1[:, t, :], h, c, whh1, H)
        h1_seq_ref[t * B:(t + 1) * B, :] = h                 # time-major (T*B, H)

    # ---- layer 2: hoisted input projection over all layer-1 outputs ----------
    gx2 = (jnp.dot(h1_seq_ref[...], wih2_ref[...],
                   preferred_element_type=jnp.float32)
           + b2_ref[...])                                    # (T*B, 4H), (t, b) order

    whh2 = whh2_ref[...]
    h = jnp.zeros((B, H), jnp.float32)
    c = jnp.zeros((B, H), jnp.float32)
    for t in range(T):
        h, c = _lstm_cell(gx2[t * B:(t + 1) * B, :], h, c, whh2, H)

    # ---- FC head: fc2(dropout(fc1(h_last))).  NOTE: matches the PyTorch
    # forward exactly — the relu result is assigned to `X` and never used;
    # dropout is identity in eval mode.
    x1 = (jnp.dot(h, fc1w_ref[...], preferred_element_type=jnp.float32)
          + fc1b_ref[...])
    out_ref[...] = (jnp.dot(x1, fc2w_ref[...], preferred_element_type=jnp.float32)
                    + fc2b_ref[...])


# ------------------------- wrapper --------------------------------------------
def prepare_params(params):
    """One-time weight prep: transpose to (in, out) layout, fuse LSTM biases."""
    prep = {"lstm": []}
    for layer in params["lstm"]:
        H4 = layer["b_ih"].shape[0]
        prep["lstm"].append({
            "wih_t": layer["w_ih"].T,                               # (Din, 4H)
            "whh_t": layer["w_hh"].T,                               # (H, 4H)
            "bias": (layer["b_ih"] + layer["b_hh"]).reshape(1, H4),  # (1, 4H)
        })
    prep["fc1w_t"] = params["fc1_w"].T                              # (H, F)
    prep["fc1b"] = params["fc1_b"].reshape(1, -1)                   # (1, F)
    prep["fc2w_t"] = params["fc2_w"].T                              # (F, C)
    prep["fc2b"] = params["fc2_b"].reshape(1, -1)                   # (1, C)
    return prep


def decoder_rnn_forward(x_btd, prep):
    """x_btd: (B, T, CNN_embed_dim) batch-first, like the PyTorch module."""
    B, T, _ = x_btd.shape
    H = prep["lstm"][0]["whh_t"].shape[0]
    C = prep["fc2w_t"].shape[1]
    l1, l2 = prep["lstm"]

    vmem_spec = pl.BlockSpec(memory_space=pltpu.MemorySpace.VMEM)
    return pl.pallas_call(
        decoder_fused_kernel,
        out_shape=jax.ShapeDtypeStruct((B, C), jnp.float32),
        in_specs=[vmem_spec] * 11,
        out_specs=vmem_spec,
        scratch_shapes=[pltpu.VMEM((T * B, H), jnp.float32)],  # layer-1 hidden seq
    )(x_btd,
      l1["wih_t"], l1["whh_t"], l1["bias"],
      l2["wih_t"], l2["whh_t"], l2["bias"],
      prep["fc1w_t"], prep["fc1b"], prep["fc2w_t"], prep["fc2b"])


# ------------------------- pure-JAX reference (for verification) --------------
def lstm_layer_ref(x_tbd, w_ih, w_hh, b_ih, b_hh):
    T, B, Din = x_tbd.shape
    H = w_hh.shape[1]

    def step(carry, x_t):
        h, c = carry
        gates = x_t @ w_ih.T + h @ w_hh.T + b_ih + b_hh
        i = jax.nn.sigmoid(gates[:, 0 * H:1 * H])
        f = jax.nn.sigmoid(gates[:, 1 * H:2 * H])
        g = jnp.tanh(gates[:, 2 * H:3 * H])
        o = jax.nn.sigmoid(gates[:, 3 * H:4 * H])
        c = f * c + i * g
        h = o * jnp.tanh(c)
        return (h, c), h

    init = (jnp.zeros((B, H), jnp.float32), jnp.zeros((B, H), jnp.float32))
    _, hs = jax.lax.scan(step, init, x_tbd)
    return hs


def decoder_rnn_ref(x_btd, params):
    x = jnp.transpose(x_btd, (1, 0, 2))
    for layer in params["lstm"]:
        x = lstm_layer_ref(x, layer["w_ih"], layer["w_hh"],
                           layer["b_ih"], layer["b_hh"])
    h_last = x[-1]
    x1 = h_last @ params["fc1_w"].T + params["fc1_b"]
    # relu discarded (matches the original forward); dropout = identity (eval)
    return x1 @ params["fc2_w"].T + params["fc2_b"]


# ------------------------- parameter init -------------------------------------
def init_params(key):
    H = RNN_hidden_nodes
    params = {"lstm": []}
    for layer_idx in range(RNN_hidden_layers):
        din = CNN_embed_dim if layer_idx == 0 else H
        bound = 1.0 / jnp.sqrt(H)
        key, k1, k2, k3, k4 = jax.random.split(key, 5)
        params["lstm"].append({
            "w_ih": jax.random.uniform(k1, (4 * H, din), jnp.float32, -bound, bound),
            "w_hh": jax.random.uniform(k2, (4 * H, H), jnp.float32, -bound, bound),
            "b_ih": jax.random.uniform(k3, (4 * H,), jnp.float32, -bound, bound),
            "b_hh": jax.random.uniform(k4, (4 * H,), jnp.float32, -bound, bound),
        })
    key, k1, k2, k3, k4 = jax.random.split(key, 5)
    b1 = 1.0 / jnp.sqrt(H)
    b2 = 1.0 / jnp.sqrt(FC_dim)
    params["fc1_w"] = jax.random.uniform(k1, (FC_dim, H), jnp.float32, -b1, b1)
    params["fc1_b"] = jax.random.uniform(k2, (FC_dim,), jnp.float32, -b1, b1)
    params["fc2_w"] = jax.random.uniform(k3, (NUM_CLASSES, FC_dim), jnp.float32, -b2, b2)
    params["fc2_b"] = jax.random.uniform(k4, (NUM_CLASSES,), jnp.float32, -b2, b2)
    return params


# ------------------------- main ------------------------------------------------
if __name__ == "__main__":
    key = jax.random.PRNGKey(0)
    key, xk, pk = jax.random.split(key, 3)

    x_RNN = jax.random.normal(xk, (BATCH, SEQ, CNN_embed_dim), jnp.float32)
    params = init_params(pk)
    prep = prepare_params(params)      # one-time weight layout prep

    out = jax.block_until_ready(decoder_rnn_forward(x_RNN, prep))
    ref = jax.block_until_ready(decoder_rnn_ref(x_RNN, params))

    assert out.shape == (BATCH, NUM_CLASSES)
    assert jnp.allclose(out, ref, atol=1e-4, rtol=1e-4), (out, ref)

    print("KERNEL_OK")
</pallas_src>

<mosaic_0001>
module attributes {stable_mosaic.version = 11 : i64} {
  func.func @decoder_fused_kernel(%arg0: memref<2x8x32xf32, #tpu.memory_space<vmem>>, %arg1: memref<32x128xf32, #tpu.memory_space<vmem>>, %arg2: memref<32x128xf32, #tpu.memory_space<vmem>>, %arg3: memref<1x128xf32, #tpu.memory_space<vmem>>, %arg4: memref<32x128xf32, #tpu.memory_space<vmem>>, %arg5: memref<32x128xf32, #tpu.memory_space<vmem>>, %arg6: memref<1x128xf32, #tpu.memory_space<vmem>>, %arg7: memref<32x16xf32, #tpu.memory_space<vmem>>, %arg8: memref<1x16xf32, #tpu.memory_space<vmem>>, %arg9: memref<16x2xf32, #tpu.memory_space<vmem>>, %arg10: memref<1x2xf32, #tpu.memory_space<vmem>>, %arg11: memref<2x2xf32, #tpu.memory_space<vmem>>, %arg12: memref<16x32xf32, #tpu.memory_space<vmem>>) attributes {dimension_semantics = [], scalar_prefetch = 0 : i64, scratch_operands = 1 : i64, tpu.core_type = #tpu.core_type<tc>} {
    %c0 = arith.constant 0 : index
    %c0_0 = arith.constant 0 : index
    %c0_1 = arith.constant 0 : index
    %0 = vector.load %arg0[%c0, %c0_0, %c0_1] : memref<2x8x32xf32, #tpu.memory_space<vmem>>, vector<2x8x32xf32>
    %1 = vector.shape_cast %0 : vector<2x8x32xf32> to vector<16x32xf32>
    %c0_2 = arith.constant 0 : index
    %c0_3 = arith.constant 0 : index
    %2 = vector.load %arg1[%c0_2, %c0_3] : memref<32x128xf32, #tpu.memory_space<vmem>>, vector<32x128xf32>
    %cst = arith.constant dense<0.000000e+00> : vector<16x128xf32>
    %3 = tpu.matmul %1, %2, %cst {dimension_numbers = #tpu.dot_dimension_numbers<[1], [0], [0], [1], [0, 0, 1, 1], [], []>} : vector<16x32xf32>, vector<32x128xf32>, vector<16x128xf32> -> vector<16x128xf32>
    %c0_4 = arith.constant 0 : index
    %c0_5 = arith.constant 0 : index
    %4 = vector.load %arg3[%c0_4, %c0_5] : memref<1x128xf32, #tpu.memory_space<vmem>>, vector<1x128xf32>
    %5 = vector.broadcast %4 : vector<1x128xf32> to vector<16x128xf32>
    %6 = arith.addf %3, %5 : vector<16x128xf32>
    %7 = vector.shape_cast %6 : vector<16x128xf32> to vector<2x8x128xf32>
    %c0_6 = arith.constant 0 : index
    %c0_7 = arith.constant 0 : index
    %8 = vector.load %arg2[%c0_6, %c0_7] : memref<32x128xf32, #tpu.memory_space<vmem>>, vector<32x128xf32>
    %cst_8 = arith.constant 0.000000e+00 : f32
    %9 = vector.broadcast %cst_8 : f32 to vector<2x32xf32>
    %cst_9 = arith.constant 0.000000e+00 : f32
    %10 = vector.broadcast %cst_9 : f32 to vector<2x32xf32>
    %11 = vector.extract_strided_slice %7 {offsets = [0, 0, 0], sizes = [2, 1, 128], strides = [1, 1, 1]} : vector<2x8x128xf32> to vector<2x1x128xf32>
    %12 = vector.shape_cast %11 : vector<2x1x128xf32> to vector<2x128xf32>
    %cst_10 = arith.constant dense<0.000000e+00> : vector<2x128xf32>
    %13 = tpu.matmul %9, %8, %cst_10 {dimension_numbers = #tpu.dot_dimension_numbers<[1], [0], [0], [1], [0, 0, 1, 1], [], []>} : vector<2x32xf32>, vector<32x128xf32>, vector<2x128xf32> -> vector<2x128xf32>
    %14 = arith.addf %12, %13 : vector<2x128xf32>
    %15 = arith.negf %14 : vector<2x128xf32>
    %16 = math.exp %15 : vector<2x128xf32>
    %cst_11 = arith.constant 1.000000e+00 : f32
    %17 = vector.broadcast %cst_11 : f32 to vector<2x128xf32>
    %18 = arith.addf %17, %16 : vector<2x128xf32>
    %19 = arith.divf %17, %18 : vector<2x128xf32>
    %20 = math.tanh %14 : vector<2x128xf32>
    %21 = vector.extract_strided_slice %19 {offsets = [0, 0], sizes = [2, 32], strides = [1, 1]} : vector<2x128xf32> to vector<2x32xf32>
    %22 = vector.extract_strided_slice %19 {offsets = [0, 32], sizes = [2, 32], strides = [1, 1]} : vector<2x128xf32> to vector<2x32xf32>
    %23 = vector.extract_strided_slice %20 {offsets = [0, 64], sizes = [2, 32], strides = [1, 1]} : vector<2x128xf32> to vector<2x32xf32>
    %24 = vector.extract_strided_slice %19 {offsets = [0, 96], sizes = [2, 32], strides = [1, 1]} : vector<2x128xf32> to vector<2x32xf32>
    %25 = arith.mulf %22, %10 : vector<2x32xf32>
    %26 = arith.mulf %21, %23 : vector<2x32xf32>
    %27 = arith.addf %25, %26 : vector<2x32xf32>
    %28 = math.tanh %27 : vector<2x32xf32>
    %29 = arith.mulf %24, %28 : vector<2x32xf32>
    %c0_12 = arith.constant 0 : index
    %c0_13 = arith.constant 0 : index
    %30 = vector.load %arg12[%c0_12, %c0_13] : memref<16x32xf32, #tpu.memory_space<vmem>>, vector<2x32xf32>
    tpu.vector_store %arg12[%c0_12, %c0_13], %29 {strides = array<i32>} : memref<16x32xf32, #tpu.memory_space<vmem>>, vector<2x32xf32>,
    %31 = vector.extract_strided_slice %7 {offsets = [0, 1, 0], sizes = [2, 1, 128], strides = [1, 1, 1]} : vector<2x8x128xf32> to vector<2x1x128xf32>
    %32 = vector.shape_cast %31 : vector<2x1x128xf32> to vector<2x128xf32>
    %cst_14 = arith.constant dense<0.000000e+00> : vector<2x128xf32>
    %33 = tpu.matmul %29, %8, %cst_14 {dimension_numbers = #tpu.dot_dimension_numbers<[1], [0], [0], [1], [0, 0, 1, 1], [], []>} : vector<2x32xf32>, vector<32x128xf32>, vector<2x128xf32> -> vector<2x128xf32>
    %34 = arith.addf %32, %33 : vector<2x128xf32>
    %35 = arith.negf %34 : vector<2x128xf32>
    %36 = math.exp %35 : vector<2x128xf32>
    %cst_15 = arith.constant 1.000000e+00 : f32
    %37 = vector.broadcast %cst_15 : f32 to vector<2x128xf32>
    %38 = arith.addf %37, %36 : vector<2x128xf32>
    %39 = arith.divf %37, %38 : vector<2x128xf32>
    %40 = math.tanh %34 : vector<2x128xf32>
    %41 = vector.extract_strided_slice %39 {offsets = [0, 0], sizes = [2, 32], strides = [1, 1]} : vector<2x128xf32> to vector<2x32xf32>
    %42 = vector.extract_strided_slice %39 {offsets = [0, 32], sizes = [2, 32], strides = [1, 1]} : vector<2x128xf32> to vector<2x32xf32>
    %43 = vector.extract_strided_slice %40 {offsets = [0, 64], sizes = [2, 32], strides = [1, 1]} : vector<2x128xf32> to vector<2x32xf32>
    %44 = vector.extract_strided_slice %39 {offsets = [0, 96], sizes = [2, 32], strides = [1, 1]} : vector<2x128xf32> to vector<2x32xf32>
    %45 = arith.mulf %42, %27 : vector<2x32xf32>
    %46 = arith.mulf %41, %43 : vector<2x32xf32>
    %47 = arith.addf %45, %46 : vector<2x32xf32>
    %48 = math.tanh %47 : vector<2x32xf32>
    %49 = arith.mulf %44, %48 : vector<2x32xf32>
    %c2 = arith.constant 2 : index
    %c0_16 = arith.constant 0 : index
    %50 = vector.load %arg12[%c2, %c0_16] : memref<16x32xf32, #tpu.memory_space<vmem>>, vector<2x32xf32>
    tpu.vector_store %arg12[%c2, %c0_16], %49 {strides = array<i32>} : memref<16x32xf32, #tpu.memory_space<vmem>>, vector<2x32xf32>,
    %51 = vector.extract_strided_slice %7 {offsets = [0, 2, 0], sizes = [2, 1, 128], strides = [1, 1, 1]} : vector<2x8x128xf32> to vector<2x1x128xf32>
    %52 = vector.shape_cast %51 : vector<2x1x128xf32> to vector<2x128xf32>
    %cst_17 = arith.constant dense<0.000000e+00> : vector<2x128xf32>
    %53 = tpu.matmul %49, %8, %cst_17 {dimension_numbers = #tpu.dot_dimension_numbers<[1], [0], [0], [1], [0, 0, 1, 1], [], []>} : vector<2x32xf32>, vector<32x128xf32>, vector<2x128xf32> -> vector<2x128xf32>
    %54 = arith.addf %52, %53 : vector<2x128xf32>
    %55 = arith.negf %54 : vector<2x128xf32>
    %56 = math.exp %55 : vector<2x128xf32>
    %cst_18 = arith.constant 1.000000e+00 : f32
    %57 = vector.broadcast %cst_18 : f32 to vector<2x128xf32>
    %58 = arith.addf %57, %56 : vector<2x128xf32>
    %59 = arith.divf %57, %58 : vector<2x128xf32>
    %60 = math.tanh %54 : vector<2x128xf32>
    %61 = vector.extract_strided_slice %59 {offsets = [0, 0], sizes = [2, 32], strides = [1, 1]} : vector<2x128xf32> to vector<2x32xf32>
    %62 = vector.extract_strided_slice %59 {offsets = [0, 32], sizes = [2, 32], strides = [1, 1]} : vector<2x128xf32> to vector<2x32xf32>
    %63 = vector.extract_strided_slice %60 {offsets = [0, 64], sizes = [2, 32], strides = [1, 1]} : vector<2x128xf32> to vector<2x32xf32>
    %64 = vector.extract_strided_slice %59 {offsets = [0, 96], sizes = [2, 32], strides = [1, 1]} : vector<2x128xf32> to vector<2x32xf32>
    %65 = arith.mulf %62, %47 : vector<2x32xf32>
    %66 = arith.mulf %61, %63 : vector<2x32xf32>
    %67 = arith.addf %65, %66 : vector<2x32xf32>
    %68 = math.tanh %67 : vector<2x32xf32>
    %69 = arith.mulf %64, %68 : vector<2x32xf32>
    %c4 = arith.constant 4 : index
    %c0_19 = arith.constant 0 : index
    %70 = vector.load %arg12[%c4, %c0_19] : memref<16x32xf32, #tpu.memory_space<vmem>>, vector<2x32xf32>
    tpu.vector_store %arg12[%c4, %c0_19], %69 {strides = array<i32>} : memref<16x32xf32, #tpu.memory_space<vmem>>, vector<2x32xf32>,
    %71 = vector.extract_strided_slice %7 {offsets = [0, 3, 0], sizes = [2, 1, 128], strides = [1, 1, 1]} : vector<2x8x128xf32> to vector<2x1x128xf32>
    %72 = vector.shape_cast %71 : vector<2x1x128xf32> to vector<2x128xf32>
    %cst_20 = arith.constant dense<0.000000e+00> : vector<2x128xf32>
    %73 = tpu.matmul %69, %8, %cst_20 {dimension_numbers = #tpu.dot_dimension_numbers<[1], [0], [0], [1], [0, 0, 1, 1], [], []>} : vector<2x32xf32>, vector<32x128xf32>, vector<2x128xf32> -> vector<2x128xf32>
    %74 = arith.addf %72, %73 : vector<2x128xf32>
    %75 = arith.negf %74 : vector<2x128xf32>
    %76 = math.exp %75 : vector<2x128xf32>
    %cst_21 = arith.constant 1.000000e+00 : f32
    %77 = vector.broadcast %cst_21 : f32 to vector<2x128xf32>
    %78 = arith.addf %77, %76 : vector<2x128xf32>
    %79 = arith.divf %77, %78 : vector<2x128xf32>
    %80 = math.tanh %74 : vector<2x128xf32>
    %81 = vector.extract_strided_slice %79 {offsets = [0, 0], sizes = [2, 32], strides = [1, 1]} : vector<2x128xf32> to vector<2x32xf32>
    %82 = vector.extract_strided_slice %79 {offsets = [0, 32], sizes = [2, 32], strides = [1, 1]} : vector<2x128xf32> to vector<2x32xf32>
    %83 = vector.extract_strided_slice %80 {offsets = [0, 64], sizes = [2, 32], strides = [1, 1]} : vector<2x128xf32> to vector<2x32xf32>
    %84 = vector.extract_strided_slice %79 {offsets = [0, 96], sizes = [2, 32], strides = [1, 1]} : vector<2x128xf32> to vector<2x32xf32>
    %85 = arith.mulf %82, %67 : vector<2x32xf32>
    %86 = arith.mulf %81, %83 : vector<2x32xf32>
    %87 = arith.addf %85, %86 : vector<2x32xf32>
    %88 = math.tanh %87 : vector<2x32xf32>
    %89 = arith.mulf %84, %88 : vector<2x32xf32>
    %c6 = arith.constant 6 : index
    %c0_22 = arith.constant 0 : index
    %90 = vector.load %arg12[%c6, %c0_22] : memref<16x32xf32, #tpu.memory_space<vmem>>, vector<2x32xf32>
    tpu.vector_store %arg12[%c6, %c0_22], %89 {strides = array<i32>} : memref<16x32xf32, #tpu.memory_space<vmem>>, vector<2x32xf32>,
    %91 = vector.extract_strided_slice %7 {offsets = [0, 4, 0], sizes = [2, 1, 128], strides = [1, 1, 1]} : vector<2x8x128xf32> to vector<2x1x128xf32>
    %92 = vector.shape_cast %91 : vector<2x1x128xf32> to vector<2x128xf32>
    %cst_23 = arith.constant dense<0.000000e+00> : vector<2x128xf32>
    %93 = tpu.matmul %89, %8, %cst_23 {dimension_numbers = #tpu.dot_dimension_numbers<[1], [0], [0], [1], [0, 0, 1, 1], [], []>} : vector<2x32xf32>, vector<32x128xf32>, vector<2x128xf32> -> vector<2x128xf32>
    %94 = arith.addf %92, %93 : vector<2x128xf32>
    %95 = arith.negf %94 : vector<2x128xf32>
    %96 = math.exp %95 : vector<2x128xf32>
    %cst_24 = arith.constant 1.000000e+00 : f32
    %97 = vector.broadcast %cst_24 : f32 to vector<2x128xf32>
    %98 = arith.addf %97, %96 : vector<2x128xf32>
    %99 = arith.divf %97, %98 : vector<2x128xf32>
    %100 = math.tanh %94 : vector<2x128xf32>
    %101 = vector.extract_strided_slice %99 {offsets = [0, 0], sizes = [2, 32], strides = [1, 1]} : vector<2x128xf32> to vector<2x32xf32>
    %102 = vector.extract_strided_slice %99 {offsets = [0, 32], sizes = [2, 32], strides = [1, 1]} : vector<2x128xf32> to vector<2x32xf32>
    %103 = vector.extract_strided_slice %100 {offsets = [0, 64], sizes = [2, 32], strides = [1, 1]} : vector<2x128xf32> to vector<2x32xf32>
    %104 = vector.extract_strided_slice %99 {offsets = [0, 96], sizes = [2, 32], strides = [1, 1]} : vector<2x128xf32> to vector<2x32xf32>
    %105 = arith.mulf %102, %87 : vector<2x32xf32>
    %106 = arith.mulf %101, %103 : vector<2x32xf32>
    %107 = arith.addf %105, %106 : vector<2x32xf32>
    %108 = math.tanh %107 : vector<2x32xf32>
    %109 = arith.mulf %104, %108 : vector<2x32xf32>
    %c8 = arith.constant 8 : index
    %c0_25 = arith.constant 0 : index
    %110 = vector.load %arg12[%c8, %c0_25] : memref<16x32xf32, #tpu.memory_space<vmem>>, vector<2x32xf32>
    tpu.vector_store %arg12[%c8, %c0_25], %109 {strides = array<i32>} : memref<16x32xf32, #tpu.memory_space<vmem>>, vector<2x32xf32>,
    %111 = vector.extract_strided_slice %7 {offsets = [0, 5, 0], sizes = [2, 1, 128], strides = [1, 1, 1]} : vector<2x8x128xf32> to vector<2x1x128xf32>
    %112 = vector.shape_cast %111 : vector<2x1x128xf32> to vector<2x128xf32>
    %cst_26 = arith.constant dense<0.000000e+00> : vector<2x128xf32>
    %113 = tpu.matmul %109, %8, %cst_26 {dimension_numbers = #tpu.dot_dimension_numbers<[1], [0], [0], [1], [0, 0, 1, 1], [], []>} : vector<2x32xf32>, vector<32x128xf32>, vector<2x128xf32> -> vector<2x128xf32>
    %114 = arith.addf %112, %113 : vector<2x128xf32>
    %115 = arith.negf %114 : vector<2x128xf32>
    %116 = math.exp %115 : vector<2x128xf32>
    %cst_27 = arith.constant 1.000000e+00 : f32
    %117 = vector.broadcast %cst_27 : f32 to vector<2x128xf32>
    %118 = arith.addf %117, %116 : vector<2x128xf32>
    %119 = arith.divf %117, %118 : vector<2x128xf32>
    %120 = math.tanh %114 : vector<2x128xf32>
    %121 = vector.extract_strided_slice %119 {offsets = [0, 0], sizes = [2, 32], strides = [1, 1]} : vector<2x128xf32> to vector<2x32xf32>
    %122 = vector.extract_strided_slice %119 {offsets = [0, 32], sizes = [2, 32], strides = [1, 1]} : vector<2x128xf32> to vector<2x32xf32>
    %123 = vector.extract_strided_slice %120 {offsets = [0, 64], sizes = [2, 32], strides = [1, 1]} : vector<2x128xf32> to vector<2x32xf32>
    %124 = vector.extract_strided_slice %119 {offsets = [0, 96], sizes = [2, 32], strides = [1, 1]} : vector<2x128xf32> to vector<2x32xf32>
    %125 = arith.mulf %122, %107 : vector<2x32xf32>
    %126 = arith.mulf %121, %123 : vector<2x32xf32>
    %127 = arith.addf %125, %126 : vector<2x32xf32>
    %128 = math.tanh %127 : vector<2x32xf32>
    %129 = arith.mulf %124, %128 : vector<2x32xf32>
    %c10 = arith.constant 10 : index
    %c0_28 = arith.constant 0 : index
    %130 = vector.load %arg12[%c10, %c0_28] : memref<16x32xf32, #tpu.memory_space<vmem>>, vector<2x32xf32>
    tpu.vector_store %arg12[%c10, %c0_28], %129 {strides = array<i32>} : memref<16x32xf32, #tpu.memory_space<vmem>>, vector<2x32xf32>,
    %131 = vector.extract_strided_slice %7 {offsets = [0, 6, 0], sizes = [2, 1, 128], strides = [1, 1, 1]} : vector<2x8x128xf32> to vector<2x1x128xf32>
    %132 = vector.shape_cast %131 : vector<2x1x128xf32> to vector<2x128xf32>
    %cst_29 = arith.constant dense<0.000000e+00> : vector<2x128xf32>
    %133 = tpu.matmul %129, %8, %cst_29 {dimension_numbers = #tpu.dot_dimension_numbers<[1], [0], [0], [1], [0, 0, 1, 1], [], []>} : vector<2x32xf32>, vector<32x128xf32>, vector<2x128xf32> -> vector<2x128xf32>
    %134 = arith.addf %132, %133 : vector<2x128xf32>
    %135 = arith.negf %134 : vector<2x128xf32>
    %136 = math.exp %135 : vector<2x128xf32>
    %cst_30 = arith.constant 1.000000e+00 : f32
    %137 = vector.broadcast %cst_30 : f32 to vector<2x128xf32>
    %138 = arith.addf %137, %136 : vector<2x128xf32>
    %139 = arith.divf %137, %138 : vector<2x128xf32>
    %140 = math.tanh %134 : vector<2x128xf32>
    %141 = vector.extract_strided_slice %139 {offsets = [0, 0], sizes = [2, 32], strides = [1, 1]} : vector<2x128xf32> to vector<2x32xf32>
    %142 = vector.extract_strided_slice %139 {offsets = [0, 32], sizes = [2, 32], strides = [1, 1]} : vector<2x128xf32> to vector<2x32xf32>
    %143 = vector.extract_strided_slice %140 {offsets = [0, 64], sizes = [2, 32], strides = [1, 1]} : vector<2x128xf32> to vector<2x32xf32>
    %144 = vector.extract_strided_slice %139 {offsets = [0, 96], sizes = [2, 32], strides = [1, 1]} : vector<2x128xf32> to vector<2x32xf32>
    %145 = arith.mulf %142, %127 : vector<2x32xf32>
    %146 = arith.mulf %141, %143 : vector<2x32xf32>
    %147 = arith.addf %145, %146 : vector<2x32xf32>
    %148 = math.tanh %147 : vector<2x32xf32>
    %149 = arith.mulf %144, %148 : vector<2x32xf32>
    %c12 = arith.constant 12 : index
    %c0_31 = arith.constant 0 : index
    %150 = vector.load %arg12[%c12, %c0_31] : memref<16x32xf32, #tpu.memory_space<vmem>>, vector<2x32xf32>
    tpu.vector_store %arg12[%c12, %c0_31], %149 {strides = array<i32>} : memref<16x32xf32, #tpu.memory_space<vmem>>, vector<2x32xf32>,
    %151 = vector.extract_strided_slice %7 {offsets = [0, 7, 0], sizes = [2, 1, 128], strides = [1, 1, 1]} : vector<2x8x128xf32> to vector<2x1x128xf32>
    %152 = vector.shape_cast %151 : vector<2x1x128xf32> to vector<2x128xf32>
    %cst_32 = arith.constant dense<0.000000e+00> : vector<2x128xf32>
    %153 = tpu.matmul %149, %8, %cst_32 {dimension_numbers = #tpu.dot_dimension_numbers<[1], [0], [0], [1], [0, 0, 1, 1], [], []>} : vector<2x32xf32>, vector<32x128xf32>, vector<2x128xf32> -> vector<2x128xf32>
    %154 = arith.addf %152, %153 : vector<2x128xf32>
    %155 = arith.negf %154 : vector<2x128xf32>
    %156 = math.exp %155 : vector<2x128xf32>
    %cst_33 = arith.constant 1.000000e+00 : f32
    %157 = vector.broadcast %cst_33 : f32 to vector<2x128xf32>
    %158 = arith.addf %157, %156 : vector<2x128xf32>
    %159 = arith.divf %157, %158 : vector<2x128xf32>
    %160 = math.tanh %154 : vector<2x128xf32>
    %161 = vector.extract_strided_slice %159 {offsets = [0, 0], sizes = [2, 32], strides = [1, 1]} : vector<2x128xf32> to vector<2x32xf32>
    %162 = vector.extract_strided_slice %159 {offsets = [0, 32], sizes = [2, 32], strides = [1, 1]} : vector<2x128xf32> to vector<2x32xf32>
    %163 = vector.extract_strided_slice %160 {offsets = [0, 64], sizes = [2, 32], strides = [1, 1]} : vector<2x128xf32> to vector<2x32xf32>
    %164 = vector.extract_strided_slice %159 {offsets = [0, 96], sizes = [2, 32], strides = [1, 1]} : vector<2x128xf32> to vector<2x32xf32>
    %165 = arith.mulf %162, %147 : vector<2x32xf32>
    %166 = arith.mulf %161, %163 : vector<2x32xf32>
    %167 = arith.addf %165, %166 : vector<2x32xf32>
    %168 = math.tanh %167 : vector<2x32xf32>
    %169 = arith.mulf %164, %168 : vector<2x32xf32>
    %c14 = arith.constant 14 : index
    %c0_34 = arith.constant 0 : index
    %170 = vector.load %arg12[%c14, %c0_34] : memref<16x32xf32, #tpu.memory_space<vmem>>, vector<2x32xf32>
    tpu.vector_store %arg12[%c14, %c0_34], %169 {strides = array<i32>} : memref<16x32xf32, #tpu.memory_space<vmem>>, vector<2x32xf32>,
    %c0_35 = arith.constant 0 : index
    %c0_36 = arith.constant 0 : index
    %171 = vector.load %arg12[%c0_35, %c0_36] : memref<16x32xf32, #tpu.memory_space<vmem>>, vector<16x32xf32>
    %c0_37 = arith.constant 0 : index
    %c0_38 = arith.constant 0 : index
    %172 = vector.load %arg4[%c0_37, %c0_38] : memref<32x128xf32, #tpu.memory_space<vmem>>, vector<32x128xf32>
    %cst_39 = arith.constant dense<0.000000e+00> : vector<16x128xf32>
    %173 = tpu.matmul %171, %172, %cst_39 {dimension_numbers = #tpu.dot_dimension_numbers<[1], [0], [0], [1], [0, 0, 1, 1], [], []>} : vector<16x32xf32>, vector<32x128xf32>, vector<16x128xf32> -> vector<16x128xf32>
    %c0_40 = arith.constant 0 : index
    %c0_41 = arith.constant 0 : index
    %174 = vector.load %arg6[%c0_40, %c0_41] : memref<1x128xf32, #tpu.memory_space<vmem>>, vector<1x128xf32>
    %175 = vector.broadcast %174 : vector<1x128xf32> to vector<16x128xf32>
    %176 = arith.addf %173, %175 : vector<16x128xf32>
    %c0_42 = arith.constant 0 : index
    %c0_43 = arith.constant 0 : index
    %177 = vector.load %arg5[%c0_42, %c0_43] : memref<32x128xf32, #tpu.memory_space<vmem>>, vector<32x128xf32>
    %cst_44 = arith.constant 0.000000e+00 : f32
    %178 = vector.broadcast %cst_44 : f32 to vector<2x32xf32>
    %cst_45 = arith.constant 0.000000e+00 : f32
    %179 = vector.broadcast %cst_45 : f32 to vector<2x32xf32>
    %180 = vector.extract_strided_slice %176 {offsets = [0, 0], sizes = [2, 128], strides = [1, 1]} : vector<16x128xf32> to vector<2x128xf32>
    %cst_46 = arith.constant dense<0.000000e+00> : vector<2x128xf32>
    %181 = tpu.matmul %178, %177, %cst_46 {dimension_numbers = #tpu.dot_dimension_numbers<[1], [0], [0], [1], [0, 0, 1, 1], [], []>} : vector<2x32xf32>, vector<32x128xf32>, vector<2x128xf32> -> vector<2x128xf32>
    %182 = arith.addf %180, %181 : vector<2x128xf32>
    %183 = arith.negf %182 : vector<2x128xf32>
    %184 = math.exp %183 : vector<2x128xf32>
    %cst_47 = arith.constant 1.000000e+00 : f32
    %185 = vector.broadcast %cst_47 : f32 to vector<2x128xf32>
    %186 = arith.addf %185, %184 : vector<2x128xf32>
    %187 = arith.divf %185, %186 : vector<2x128xf32>
    %188 = math.tanh %182 : vector<2x128xf32>
    %189 = vector.extract_strided_slice %187 {offsets = [0, 0], sizes = [2, 32], strides = [1, 1]} : vector<2x128xf32> to vector<2x32xf32>
    %190 = vector.extract_strided_slice %187 {offsets = [0, 32], sizes = [2, 32], strides = [1, 1]} : vector<2x128xf32> to vector<2x32xf32>
    %191 = vector.extract_strided_slice %188 {offsets = [0, 64], sizes = [2, 32], strides = [1, 1]} : vector<2x128xf32> to vector<2x32xf32>
    %192 = vector.extract_strided_slice %187 {offsets = [0, 96], sizes = [2, 32], strides = [1, 1]} : vector<2x128xf32> to vector<2x32xf32>
    %193 = arith.mulf %190, %179 : vector<2x32xf32>
    %194 = arith.mulf %189, %191 : vector<2x32xf32>
    %195 = arith.addf %193, %194 : vector<2x32xf32>
    %196 = math.tanh %195 : vector<2x32xf32>
    %197 = arith.mulf %192, %196 : vector<2x32xf32>
    %198 = vector.extract_strided_slice %176 {offsets = [2, 0], sizes = [2, 128], strides = [1, 1]} : vector<16x128xf32> to vector<2x128xf32>
    %cst_48 = arith.constant dense<0.000000e+00> : vector<2x128xf32>
    %199 = tpu.matmul %197, %177, %cst_48 {dimension_numbers = #tpu.dot_dimension_numbers<[1], [0], [0], [1], [0, 0, 1, 1], [], []>} : vector<2x32xf32>, vector<32x128xf32>, vector<2x128xf32> -> vector<2x128xf32>
    %200 = arith.addf %198, %199 : vector<2x128xf32>
    %201 = arith.negf %200 : vector<2x128xf32>
    %202 = math.exp %201 : vector<2x128xf32>
    %cst_49 = arith.constant 1.000000e+00 : f32
    %203 = vector.broadcast %cst_49 : f32 to vector<2x128xf32>
    %204 = arith.addf %203, %202 : vector<2x128xf32>
    %205 = arith.divf %203, %204 : vector<2x128xf32>
    %206 = math.tanh %200 : vector<2x128xf32>
    %207 = vector.extract_strided_slice %205 {offsets = [0, 0], sizes = [2, 32], strides = [1, 1]} : vector<2x128xf32> to vector<2x32xf32>
    %208 = vector.extract_strided_slice %205 {offsets = [0, 32], sizes = [2, 32], strides = [1, 1]} : vector<2x128xf32> to vector<2x32xf32>
    %209 = vector.extract_strided_slice %206 {offsets = [0, 64], sizes = [2, 32], strides = [1, 1]} : vector<2x128xf32> to vector<2x32xf32>
    %210 = vector.extract_strided_slice %205 {offsets = [0, 96], sizes = [2, 32], strides = [1, 1]} : vector<2x128xf32> to vector<2x32xf32>
    %211 = arith.mulf %208, %195 : vector<2x32xf32>
    %212 = arith.mulf %207, %209 : vector<2x32xf32>
    %213 = arith.addf %211, %212 : vector<2x32xf32>
    %214 = math.tanh %213 : vector<2x32xf32>
    %215 = arith.mulf %210, %214 : vector<2x32xf32>
    %216 = vector.extract_strided_slice %176 {offsets = [4, 0], sizes = [2, 128], strides = [1, 1]} : vector<16x128xf32> to vector<2x128xf32>
    %cst_50 = arith.constant dense<0.000000e+00> : vector<2x128xf32>
    %217 = tpu.matmul %215, %177, %cst_50 {dimension_numbers = #tpu.dot_dimension_numbers<[1], [0], [0], [1], [0, 0, 1, 1], [], []>} : vector<2x32xf32>, vector<32x128xf32>, vector<2x128xf32> -> vector<2x128xf32>
    %218 = arith.addf %216, %217 : vector<2x128xf32>
    %219 = arith.negf %218 : vector<2x128xf32>
    %220 = math.exp %219 : vector<2x128xf32>
    %cst_51 = arith.constant 1.000000e+00 : f32
    %221 = vector.broadcast %cst_51 : f32 to vector<2x128xf32>
    %222 = arith.addf %221, %220 : vector<2x128xf32>
    %223 = arith.divf %221, %222 : vector<2x128xf32>
    %224 = math.tanh %218 : vector<2x128xf32>
    %225 = vector.extract_strided_slice %223 {offsets = [0, 0], sizes = [2, 32], strides = [1, 1]} : vector<2x128xf32> to vector<2x32xf32>
    %226 = vector.extract_strided_slice %223 {offsets = [0, 32], sizes = [2, 32], strides = [1, 1]} : vector<2x128xf32> to vector<2x32xf32>
    %227 = vector.extract_strided_slice %224 {offsets = [0, 64], sizes = [2, 32], strides = [1, 1]} : vector<2x128xf32> to vector<2x32xf32>
    %228 = vector.extract_strided_slice %223 {offsets = [0, 96], sizes = [2, 32], strides = [1, 1]} : vector<2x128xf32> to vector<2x32xf32>
    %229 = arith.mulf %226, %213 : vector<2x32xf32>
    %230 = arith.mulf %225, %227 : vector<2x32xf32>
    %231 = arith.addf %229, %230 : vector<2x32xf32>
    %232 = math.tanh %231 : vector<2x32xf32>
    %233 = arith.mulf %228, %232 : vector<2x32xf32>
    %234 = vector.extract_strided_slice %176 {offsets = [6, 0], sizes = [2, 128], strides = [1, 1]} : vector<16x128xf32> to vector<2x128xf32>
    %cst_52 = arith.constant dense<0.000000e+00> : vector<2x128xf32>
    %235 = tpu.matmul %233, %177, %cst_52 {dimension_numbers = #tpu.dot_dimension_numbers<[1], [0], [0], [1], [0, 0, 1, 1], [], []>} : vector<2x32xf32>, vector<32x128xf32>, vector<2x128xf32> -> vector<2x128xf32>
    %236 = arith.addf %234, %235 : vector<2x128xf32>
    %237 = arith.negf %236 : vector<2x128xf32>
    %238 = math.exp %237 : vector<2x128xf32>
    %cst_53 = arith.constant 1.000000e+00 : f32
    %239 = vector.broadcast %cst_53 : f32 to vector<2x128xf32>
    %240 = arith.addf %239, %238 : vector<2x128xf32>
    %241 = arith.divf %239, %240 : vector<2x128xf32>
    %242 = math.tanh %236 : vector<2x128xf32>
    %243 = vector.extract_strided_slice %241 {offsets = [0, 0], sizes = [2, 32], strides = [1, 1]} : vector<2x128xf32> to vector<2x32xf32>
    %244 = vector.extract_strided_slice %241 {offsets = [0, 32], sizes = [2, 32], strides = [1, 1]} : vector<2x128xf32> to vector<2x32xf32>
    %245 = vector.extract_strided_slice %242 {offsets = [0, 64], sizes = [2, 32], strides = [1, 1]} : vector<2x128xf32> to vector<2x32xf32>
    %246 = vector.extract_strided_slice %241 {offsets = [0, 96], sizes = [2, 32], strides = [1, 1]} : vector<2x128xf32> to vector<2x32xf32>
    %247 = arith.mulf %244, %231 : vector<2x32xf32>
    %248 = arith.mulf %243, %245 : vector<2x32xf32>
    %249 = arith.addf %247, %248 : vector<2x32xf32>
    %250 = math.tanh %249 : vector<2x32xf32>
    %251 = arith.mulf %246, %250 : vector<2x32xf32>
    %252 = vector.extract_strided_slice %176 {offsets = [8, 0], sizes = [2, 128], strides = [1, 1]} : vector<16x128xf32> to vector<2x128xf32>
    %cst_54 = arith.constant dense<0.000000e+00> : vector<2x128xf32>
    %253 = tpu.matmul %251, %177, %cst_54 {dimension_numbers = #tpu.dot_dimension_numbers<[1], [0], [0], [1], [0, 0, 1, 1], [], []>} : vector<2x32xf32>, vector<32x128xf32>, vector<2x128xf32> -> vector<2x128xf32>
    %254 = arith.addf %252, %253 : vector<2x128xf32>
    %255 = arith.negf %254 : vector<2x128xf32>
    %256 = math.exp %255 : vector<2x128xf32>
    %cst_55 = arith.constant 1.000000e+00 : f32
    %257 = vector.broadcast %cst_55 : f32 to vector<2x128xf32>
    %258 = arith.addf %257, %256 : vector<2x128xf32>
    %259 = arith.divf %257, %258 : vector<2x128xf32>
    %260 = math.tanh %254 : vector<2x128xf32>
    %261 = vector.extract_strided_slice %259 {offsets = [0, 0], sizes = [2, 32], strides = [1, 1]} : vector<2x128xf32> to vector<2x32xf32>
    %262 = vector.extract_strided_slice %259 {offsets = [0, 32], sizes = [2, 32], strides = [1, 1]} : vector<2x128xf32> to vector<2x32xf32>
    %263 = vector.extract_strided_slice %260 {offsets = [0, 64], sizes = [2, 32], strides = [1, 1]} : vector<2x128xf32> to vector<2x32xf32>
    %264 = vector.extract_strided_slice %259 {offsets = [0, 96], sizes = [2, 32], strides = [1, 1]} : vector<2x128xf32> to vector<2x32xf32>
    %265 = arith.mulf %262, %249 : vector<2x32xf32>
    %266 = arith.mulf %261, %263 : vector<2x32xf32>
    %267 = arith.addf %265, %266 : vector<2x32xf32>
    %268 = math.tanh %267 : vector<2x32xf32>
    %269 = arith.mulf %264, %268 : vector<2x32xf32>
    %270 = vector.extract_strided_slice %176 {offsets = [10, 0], sizes = [2, 128], strides = [1, 1]} : vector<16x128xf32> to vector<2x128xf32>
    %cst_56 = arith.constant dense<0.000000e+00> : vector<2x128xf32>
    %271 = tpu.matmul %269, %177, %cst_56 {dimension_numbers = #tpu.dot_dimension_numbers<[1], [0], [0], [1], [0, 0, 1, 1], [], []>} : vector<2x32xf32>, vector<32x128xf32>, vector<2x128xf32> -> vector<2x128xf32>
    %272 = arith.addf %270, %271 : vector<2x128xf32>
    %273 = arith.negf %272 : vector<2x128xf32>
    %274 = math.exp %273 : vector<2x128xf32>
    %cst_57 = arith.constant 1.000000e+00 : f32
    %275 = vector.broadcast %cst_57 : f32 to vector<2x128xf32>
    %276 = arith.addf %275, %274 : vector<2x128xf32>
    %277 = arith.divf %275, %276 : vector<2x128xf32>
    %278 = math.tanh %272 : vector<2x128xf32>
    %279 = vector.extract_strided_slice %277 {offsets = [0, 0], sizes = [2, 32], strides = [1, 1]} : vector<2x128xf32> to vector<2x32xf32>
    %280 = vector.extract_strided_slice %277 {offsets = [0, 32], sizes = [2, 32], strides = [1, 1]} : vector<2x128xf32> to vector<2x32xf32>
    %281 = vector.extract_strided_slice %278 {offsets = [0, 64], sizes = [2, 32], strides = [1, 1]} : vector<2x128xf32> to vector<2x32xf32>
    %282 = vector.extract_strided_slice %277 {offsets = [0, 96], sizes = [2, 32], strides = [1, 1]} : vector<2x128xf32> to vector<2x32xf32>
    %283 = arith.mulf %280, %267 : vector<2x32xf32>
    %284 = arith.mulf %279, %281 : vector<2x32xf32>
    %285 = arith.addf %283, %284 : vector<2x32xf32>
    %286 = math.tanh %285 : vector<2x32xf32>
    %287 = arith.mulf %282, %286 : vector<2x32xf32>
    %288 = vector.extract_strided_slice %176 {offsets = [12, 0], sizes = [2, 128], strides = [1, 1]} : vector<16x128xf32> to vector<2x128xf32>
    %cst_58 = arith.constant dense<0.000000e+00> : vector<2x128xf32>
    %289 = tpu.matmul %287, %177, %cst_58 {dimension_numbers = #tpu.dot_dimension_numbers<[1], [0], [0], [1], [0, 0, 1, 1], [], []>} : vector<2x32xf32>, vector<32x128xf32>, vector<2x128xf32> -> vector<2x128xf32>
    %290 = arith.addf %288, %289 : vector<2x128xf32>
    %291 = arith.negf %290 : vector<2x128xf32>
    %292 = math.exp %291 : vector<2x128xf32>
    %cst_59 = arith.constant 1.000000e+00 : f32
    %293 = vector.broadcast %cst_59 : f32 to vector<2x128xf32>
    %294 = arith.addf %293, %292 : vector<2x128xf32>
    %295 = arith.divf %293, %294 : vector<2x128xf32>
    %296 = math.tanh %290 : vector<2x128xf32>
    %297 = vector.extract_strided_slice %295 {offsets = [0, 0], sizes = [2, 32], strides = [1, 1]} : vector<2x128xf32> to vector<2x32xf32>
    %298 = vector.extract_strided_slice %295 {offsets = [0, 32], sizes = [2, 32], strides = [1, 1]} : vector<2x128xf32> to vector<2x32xf32>
    %299 = vector.extract_strided_slice %296 {offsets = [0, 64], sizes = [2, 32], strides = [1, 1]} : vector<2x128xf32> to vector<2x32xf32>
    %300 = vector.extract_strided_slice %295 {offsets = [0, 96], sizes = [2, 32], strides = [1, 1]} : vector<2x128xf32> to vector<2x32xf32>
    %301 = arith.mulf %298, %285 : vector<2x32xf32>
    %302 = arith.mulf %297, %299 : vector<2x32xf32>
    %303 = arith.addf %301, %302 : vector<2x32xf32>
    %304 = math.tanh %303 : vector<2x32xf32>
    %305 = arith.mulf %300, %304 : vector<2x32xf32>
    %306 = vector.extract_strided_slice %176 {offsets = [14, 0], sizes = [2, 128], strides = [1, 1]} : vector<16x128xf32> to vector<2x128xf32>
    %cst_60 = arith.constant dense<0.000000e+00> : vector<2x128xf32>
    %307 = tpu.matmul %305, %177, %cst_60 {dimension_numbers = #tpu.dot_dimension_numbers<[1], [0], [0], [1], [0, 0, 1, 1], [], []>} : vector<2x32xf32>, vector<32x128xf32>, vector<2x128xf32> -> vector<2x128xf32>
    %308 = arith.addf %306, %307 : vector<2x128xf32>
    %309 = arith.negf %308 : vector<2x128xf32>
    %310 = math.exp %309 : vector<2x128xf32>
    %cst_61 = arith.constant 1.000000e+00 : f32
    %311 = vector.broadcast %cst_61 : f32 to vector<2x128xf32>
    %312 = arith.addf %311, %310 : vector<2x128xf32>
    %313 = arith.divf %311, %312 : vector<2x128xf32>
    %314 = math.tanh %308 : vector<2x128xf32>
    %315 = vector.extract_strided_slice %313 {offsets = [0, 0], sizes = [2, 32], strides = [1, 1]} : vector<2x128xf32> to vector<2x32xf32>
    %316 = vector.extract_strided_slice %313 {offsets = [0, 32], sizes = [2, 32], strides = [1, 1]} : vector<2x128xf32> to vector<2x32xf32>
    %317 = vector.extract_strided_slice %314 {offsets = [0, 64], sizes = [2, 32], strides = [1, 1]} : vector<2x128xf32> to vector<2x32xf32>
    %318 = vector.extract_strided_slice %313 {offsets = [0, 96], sizes = [2, 32], strides = [1, 1]} : vector<2x128xf32> to vector<2x32xf32>
    %319 = arith.mulf %316, %303 : vector<2x32xf32>
    %320 = arith.mulf %315, %317 : vector<2x32xf32>
    %321 = arith.addf %319, %320 : vector<2x32xf32>
    %322 = math.tanh %321 : vector<2x32xf32>
    %323 = arith.mulf %318, %322 : vector<2x32xf32>
    %c0_62 = arith.constant 0 : index
    %c0_63 = arith.constant 0 : index
    %324 = vector.load %arg7[%c0_62, %c0_63] : memref<32x16xf32, #tpu.memory_space<vmem>>, vector<32x16xf32>
    %cst_64 = arith.constant dense<0.000000e+00> : vector<2x16xf32>
    %325 = tpu.matmul %323, %324, %cst_64 {dimension_numbers = #tpu.dot_dimension_numbers<[1], [0], [0], [1], [0, 0, 1, 1], [], []>} : vector<2x32xf32>, vector<32x16xf32>, vector<2x16xf32> -> vector<2x16xf32>
    %c0_65 = arith.constant 0 : index
    %c0_66 = arith.constant 0 : index
    %326 = vector.load %arg8[%c0_65, %c0_66] : memref<1x16xf32, #tpu.memory_space<vmem>>, vector<1x16xf32>
    %327 = vector.broadcast %326 : vector<1x16xf32> to vector<2x16xf32>
    %328 = arith.addf %325, %327 : vector<2x16xf32>
    %c0_67 = arith.constant 0 : index
    %c0_68 = arith.constant 0 : index
    %329 = vector.load %arg9[%c0_67, %c0_68] : memref<16x2xf32, #tpu.memory_space<vmem>>, vector<16x2xf32>
    %cst_69 = arith.constant dense<0.000000e+00> : vector<2x2xf32>
    %330 = tpu.matmul %328, %329, %cst_69 {dimension_numbers = #tpu.dot_dimension_numbers<[1], [0], [0], [1], [0, 0, 1, 1], [], []>} : vector<2x16xf32>, vector<16x2xf32>, vector<2x2xf32> -> vector<2x2xf32>
    %c0_70 = arith.constant 0 : index
    %c0_71 = arith.constant 0 : index
    %331 = vector.load %arg10[%c0_70, %c0_71] : memref<1x2xf32, #tpu.memory_space<vmem>>, vector<1x2xf32>
    %332 = vector.broadcast %331 : vector<1x2xf32> to vector<2x2xf32>
    %333 = arith.addf %330, %332 : vector<2x2xf32>
    %c0_72 = arith.constant 0 : index
    %c0_73 = arith.constant 0 : index
    %334 = vector.load %arg11[%c0_72, %c0_73] : memref<2x2xf32, #tpu.memory_space<vmem>>, vector<2x2xf32>
    tpu.vector_store %arg11[%c0_72, %c0_73], %333 {strides = array<i32>} : memref<2x2xf32, #tpu.memory_space<vmem>>, vector<2x2xf32>,
    return
  }
}

</mosaic_0001>

<bundles_post_ra>
// kernel: tpu_custom_call.1
= control target key start
LH: loop header
LB: loop body
LE: loop exit
PB: predicated region body
PF: predicated region fallthrough
CT: control target
= control target key end

     0   :  { %16 = vsyncpa [#allocation4], 0  ;;  %s3725_s0 = inlined_call_operand.hbm [shape: f32[2,8,32], index: 0, kind: input, shape index: {}]   ;;  %s3726_s1 = inlined_call_operand.vmem [shape: f32[32,128], index: 1, kind: input, shape index: {}]   ;;  %s3727_s2 = inlined_call_operand.vmem [shape: f32[32,128], index: 2, kind: input, shape index: {}]   ;;  %s3728_s3 = inlined_call_operand.vmem [shape: f32[1,128], index: 3, kind: input, shape index: {}]   ;;  %s3729_s4 = inlined_call_operand.hbm [shape: f32[32,128], index: 4, kind: input, shape index: {}]   ;;  %s3730_s5 = inlined_call_operand.hbm [shape: f32[32,128], index: 5, kind: input, shape index: {}]   ;;  %s3731_s6 = inlined_call_operand.vmem [shape: f32[1,128], index: 6, kind: input, shape index: {}]   ;;  %s3732_s7 = inlined_call_operand.vmem [shape: f32[32,16], index: 7, kind: input, shape index: {}]   ;;  %s3733_s8 = inlined_call_operand.vmem [shape: f32[1,16], index: 8, kind: input, shape index: {}]   ;;  %s3734_s9 = inlined_call_operand.vmem [shape: f32[16,2], index: 9, kind: input, shape index: {}]   ;;  %s3735_s10 = inlined_call_operand.vmem [shape: f32[1,2], index: 10, kind: input, shape index: {}]   ;;  %s3736_s11 = inlined_call_operand.hbm [shape: f32[2,2], index: 11, kind: output, shape index: {}]  }
   0x1   :  { %17 = vsyncpa [#allocation7], 0 }
   0x2   :  { %18 = vsyncpa [#allocation5], 0  ;;  %s3255_s17 = smov [#allocation6]   ;;  %s3256_s19 = smov [#allocation3]  }
   0x3   :  { %s42_s18 = sshll.u32 %s3255_s17, 4  ;;  %s24_s20 = sshll.u32 %s3256_s19, 4  ;;  %s43_s18 = int_to_ptr.vmem [resolvable:$true] %s42_s18  ;;  %s3326_s20 = int_to_ptr.vmem [resolvable:$true] %s24_s20 }
   0x4   :  { %s3161_s23 = scalar_lea.hbm %s3729_s4, 512 }
   0x5   :  { %p3162_p0 = scmp.ne.s32.totalorder %s3729_s4, %s3161_s23  ;;  %p3165_p1 = scmp.lt.u32.totalorder %s3161_s23, %s3729_s4 }
   0x7   :  { %p3167_p2 = pnand %p3165_p1, %p3162_p0 }
   0x9   :  { %3170 = shalt.err (!%p3167_p2)
}
   0xa   :  { %s3171_s28 = scalar_lea.vmem %s43_s18, 512  ;;  %p3176_p4 = scmp.lt.s32.totalorder %s43_s18, %s43_s18 }
   0xb   :  { %p3172_p3 = scmp.ne.s32.totalorder %s43_s18, %s3171_s28  ;;  %p3177_p5 = scmp.lt.s32.totalorder %s3171_s28, %s3171_s28 }
   0xd   :  { %p3178_p6 = por %p3177_p5, %p3176_p4 }
   0xf   :  { %p3179_p7 = pnand %p3178_p6, %p3172_p3 }
  0x11   :  { %3182 = shalt.err (!%p3179_p7)
}
  0x12   :  { %s3257_s29 = smov 128   ;;  %s3258_s30 = smov 8  }
  0x13   :  { %48 = dma.hbm_to_vmem [thread:$0]  %s3729_s4, 512, %s43_s18, [#allocation7], %s3257_s29, %s3257_s29, %s3258_s30  }
  0x14   :  { %s3183_s16 = scalar_lea.hbm %s3725_s0, 256 }
  0x15   :  { %p3184_p8 = scmp.ne.s32.totalorder %s3725_s0, %s3183_s16  ;;  %p3187_p9 = scmp.lt.u32.totalorder %s3183_s16, %s3725_s0 }
  0x17   :  { %p3189_p10 = pnand %p3187_p9, %p3184_p8 }
  0x19   :  { %3192 = shalt.err (!%p3189_p10)
}
  0x1a   :  { %s3193_s23 = scalar_lea.vmem %s3326_s20, 256  ;;  %p3198_p12 = scmp.lt.s32.totalorder %s3326_s20, %s3326_s20 }
  0x1b   :  { %p3194_p11 = scmp.ne.s32.totalorder %s3326_s20, %s3193_s23  ;;  %p3199_p13 = scmp.lt.s32.totalorder %s3193_s23, %s3193_s23 }
  0x1d   :  { %p3200_p0 = por %p3199_p13, %p3198_p12 }
  0x1f   :  { %p3201_p1 = pnand %p3200_p0, %p3194_p11 }
  0x21   :  { %3204 = shalt.err (!%p3201_p1)
}
  0x22   :  { %30 = dma.hbm_to_vmem [thread:$0]  %s3725_s0, 256, %s3326_s20, [#allocation4], %s3257_s29, %s3257_s29, %s3258_s30  }
  0x23   :  { %s3259_s24 = smov [#allocation8]   ;;  %s3205_s28 = scalar_lea.hbm %s3730_s5, 512 }
  0x24   :  { %s54_s25 = sshll.u32 %s3259_s24, 4  ;;  %p3206_p2 = scmp.ne.s32.totalorder %s3730_s5, %s3205_s28  ;;  %s55_s25 = int_to_ptr.vmem [resolvable:$true] %s54_s25 }
  0x25   :  { %p3209_p3 = scmp.lt.u32.totalorder %s3205_s28, %s3730_s5 }
  0x27   :  { %p3211_p4 = pnand %p3209_p3, %p3206_p2 }
  0x29   :  { %3214 = shalt.err (!%p3211_p4)
}
  0x2a   :  { %s3215_s16 = scalar_lea.vmem %s55_s25, 512  ;;  %p3220_p6 = scmp.lt.s32.totalorder %s55_s25, %s55_s25 }
  0x2b   :  { %p3216_p5 = scmp.ne.s32.totalorder %s55_s25, %s3215_s16  ;;  %p3221_p7 = scmp.lt.s32.totalorder %s3215_s16, %s3215_s16 }
  0x2d   :  { %p3222_p8 = por %p3221_p7, %p3220_p6 }
  0x2f   :  { %p3223_p9 = pnand %p3222_p8, %p3216_p5 }
  0x31   :  { %3226 = shalt.err (!%p3223_p9)
}
  0x32   :  { %60 = dma.hbm_to_vmem [thread:$0]  %s3730_s5, 512, %s55_s25, [#allocation7], %s3257_s29, %s3257_s29, %s3258_s30  }
  0x33   :  { %3249 = dma.done.wait [#allocation4], 256  }
  0x34   :  { %3250 = vsyncadd [#allocation4], 4294967040 }
  0x35   :  { %3251 = dma.done.wait [#allocation7], 1024  }
  0x36   :  { %3252 = vsyncadd [#allocation7], 4294966272  ;;  %v3260_v0 = vmov 0.0|0.0   ;;  %vm3261_vm0 = vmmov 0   ;;  %v3262_v1 = vmov 0.0   ;;  %v82_v2 = vld [vmem:[%s3726_s1] sm:$0xff] }
  0x37   :  { %2845 = vmatprep.subr.bf16.mxu1 %v3260_v0  ;;  %2640 = vmatprep.mubr.msk.f32.mxu1 %vm3261_vm0, %v3262_v1  ;;  %v83_v3 = vld [vmem:[%s3726_s1 + $0x8] sm:$0xff]  ;;  %v175_v4 = vld [vmem:[%s3727_s2] sm:$0xff]  ;;  %vm93_vm1 = vcmask 261120   ;;  %v84_v7 = vld [vmem:[%s3726_s1 + $0x10] sm:$0xff]  ;;  %s3263_s13 = smov 64   ;;  %vm309_vm2 = vcmask 1041409  }
  0x38   :  { %v2837_v5 = vpack.c.bf16 %v83_v3, %v82_v2  ;;  %v176_v6 = vld [vmem:[%s3727_s2 + $0x8] sm:$0xff]  ;;  %v85_v8 = vld [vmem:[%s3726_s1 + $0x18] sm:$0xff]  ;;  %v177_v11 = vld [vmem:[%s3727_s2 + $0x10] sm:$0xff]  ;;  %vm314_vm3 = vcmask 254976   ;;  %vm451_vm4 = vcmask 1042434   ;;  %vm598_vm5 = vcmask 1043459  }
  0x39   :  { %v3399_v9 = vpack.c.bf16 %v176_v6, %v175_v4  ;;  %v2841_v10 = vpack.c.bf16 %v85_v8, %v84_v7  ;;  %v178_v12 = vld [vmem:[%s3727_s2 + $0x18] sm:$0xff]  ;;  %v80_v13 = vld [vmem:[#allocation3] sm:$0xff]  ;;  %v2473_v16 = vld [vmem:[%s3728_s3] ss:$0 sm:$0xff]  ;;  %s3264_s3 = smov 32   ;;  %vm746_vm6 = vcmask 1044484  }
  0x3a   :  { %2838 = vmatprep.subr.bf16.mxu0 %v2837_v5  ;;  %2629 = vmatprep.mubr.msk.f32.mxu0 %vm93_vm1, %v80_v13  ;;  %v3409_v14 = vpack.c.bf16 %v178_v12, %v177_v11  ;;  %v81_v15 = vld [vmem:[#allocation3 + $0x8] sm:$0xff]  ;;  %vm894_vm7 = vcmask 1045509   ;;  %vm1042_vm8 = vcmask 1046534   ;;  %vm1190_vm9 = vcmask 1047559   ;;  %s3265_s24 = smov [#allocation9]  }
  0x3b   :  { %2847 = vmatpush3.bf16.msra.mxu1 %v3399_v9  ;;  %2840 = vmatpush3.bf16.msra.mxu0 %v2837_v5  ;;  %vm603_vm10 = vcmask 257026   ;;  %vm456_vm11 = vcmask 256001   ;;  %vm899_vm12 = vcmask 259076   ;;  %vm751_vm13 = vcmask 258051   ;;  %s2463_s25 = sshll.u32 %s3265_s24, 4  ;;  %s2464_s25 = int_to_ptr.vmem [resolvable:$true] %s2463_s25 }
  0x3c   :  { %2848 = vmatprep.subr.bf16.mxu1 %v3260_v0  ;;  %2842 = vmatprep.subr.bf16.mxu0 %v2841_v10  ;;  %vm1195_vm14 = vcmask 261126   ;;  %vm1047_vm15 = vcmask 260101   ;;  %s3227_s26 = scalar_lea.vmem %s2464_s25, 32  ;;  %p3232_p11 = scmp.lt.s32.totalorder %s2464_s25, %s2464_s25 }
  0x3d   :  { %p3228_p10 = scmp.ne.s32.totalorder %s2464_s25, %s3227_s26  ;;  %p3233_p12 = scmp.lt.s32.totalorder %s3227_s26, %s3227_s26 }
  0x3f   :  { %2850 = vmatpush3.bf16.msra.mxu1 %v3409_v14  ;;  %2844 = vmatpush3.bf16.msra.mxu0 %v2841_v10  ;;  %p3234_p13 = por %p3233_p12, %p3232_p11 }
  0x40   :  { %2851 = vmatprep.subr.bf16.mxu0 %v3260_v0  ;;  %2857 = vmatprep.subr.bf16.mxu1 %v3260_v0 }
  0x41   :  { %p3235_p0 = pnand %p3234_p13, %p3228_p10 }
  0x42   :  { %2641 = vmatmul.mubr.f32.vlgmr.msra.gmra.mrb[0].mxu1 %v3262_v1  ;;  %2630 = vmatmul.mubr.msk.f32.vlgmr.msra.gmra.mrb[0].mxu0 %vm93_vm1, %v81_v15 }
  0x43   :  { %2853 = vmatpush3.bf16.msra.mxu0 %v3399_v9  ;;  %2651 = vmatprep.mubr.msk.f32.mxu0 %vm3261_vm0, %v3262_v1 }
  0x44   :  { %2854 = vmatprep.subr.bf16.mxu0 %v3260_v0  ;;  %2859 = vmatpush3.bf16.msra.mxu1 %v3399_v9 }
  0x45   :  { %2860 = vmatprep.subr.bf16.mxu1 %v3260_v0  ;;  %2662 = vmatprep.mubr.msk.f32.mxu1 %vm3261_vm0, %v3262_v1 }
  0x47   :  { %2856 = vmatpush3.bf16.msra.mxu0 %v3409_v14 }
  0x48   :  { %2862 = vmatpush3.bf16.msra.mxu1 %v3409_v14  ;;  %2863 = vmatprep.subr.bf16.mxu0 %v3260_v0 }
  0x49   :  { %2869 = vmatprep.subr.bf16.mxu1 %v3260_v0 }
 0x115   :  { %v248_v17 = vpop.f32.mrb[0].mxu1  ;;  %v2631_v18 = vpop.f32.mrb[0].mxu0 }
 0x116   :  { %v253_v19 = vrot.slane %v248_v17, 1  ;;  %v3432_v20 = vadd.f32 %v2631_v18, %v2473_v16  ;;  %v2642_v21 = vpop.f32.mrb[1].mxu1  ;;  %v166_v22 = vpop.f32.mrb[1].mxu0 }
 0x117   :  { %v3434_v23 = vadd.f32 %v2473_v16, %v166_v22 }
 0x118   :  { %v257_v24 = vadd.f32 %v253_v19, %v3432_v20 }
 0x119   :  { %v256_v25 = vadd.f32 %v248_v17, %v3434_v23 }
 0x11a   :  { %2969 = vtanh.f32 %v257_v24  ;;  %v2477_v28 = vmul.f32 -1.442695, %v257_v24 }
 0x11b   :  { %2971 = vtanh.f32 %v256_v25  ;;  %v2476_v29 = vmul.f32 -1.442695, %v256_v25 }
 0x11c   :  { %2973 = vpow2.f32 %v2477_v28 }
 0x11d   :  { %2975 = vpow2.f32 %v2476_v29 }
 0x124   :  { %v2970_v26 = vpop.eup %2969 }
 0x125   :  { %278 = vrot.lane.b32.xlu0 %v2970_v26, %s3263_s13  ;;  %v2972_v27 = vpop.eup %2971 }
 0x126   :  { %v2974_v30 = vpop.eup %2973 }
 0x127   :  { %v265_v31 = vadd.f32 1.0, %v2974_v30  ;;  %v2976_v32 = vpop.eup %2975 }
 0x128   :  { %v264_v33 = vadd.f32 1.0, %v2976_v32 }
 0x129   :  { %276 = vrot.lane.b32.xlu0 %v2972_v27, %s3263_s13  ;;  %2977 = vrcp.f32 %v265_v31 }
 0x12a   :  { %2979 = vrcp.f32 %v264_v33 }
 0x133   :  { %v2978_v34 = vpop.eup %2977 }
 0x134   :  { %v2980_v37 = vpop.eup %2979  ;;  %v273_v40 = vmul.f32 0.0, %v2978_v34 }
 0x135   :  { %v272_v43 = vmul.f32 0.0, %v2980_v37 }
 0x197   :  { %v279_v35 = vpop.permute.xlu0 %278 }
 0x198   :  { %v283_v36 = vmul.f32 %v2978_v34, %v279_v35 }
 0x19a   :  { %288 = vrot.lane.b32.xlu1 %v283_v36, %s3264_s3 }
 0x19b   :  { %v277_v38 = vpop.permute.xlu0 %276 }
 0x19c   :  { %v282_v39 = vmul.f32 %v2980_v37, %v277_v38 }
 0x19e   :  { %286 = vrot.lane.b32.xlu1 %v282_v39, %s3264_s3 }
 0x20c   :  { %v289_v41 = vpop.permute.xlu1 %288 }
 0x20d   :  { %v293_v42 = vadd.f32 %v289_v41, %v273_v40 }
 0x20f   :  { %2981 = vtanh.f32 %v293_v42  ;;  %v411_v13 = vrot.slane %v293_v42, 7 }
 0x210   :  { %v287_v44 = vpop.permute.xlu1 %286 }
 0x211   :  { %v292_v45 = vadd.f32 %v287_v44, %v272_v43 }
 0x213   :  { %2983 = vtanh.f32 %v292_v45  ;;  %v410_v16 = vrot.slane %v292_v45, 7 }
 0x219   :  { %v2982_v46 = vpop.eup %2981 }
 0x21a   :  { %300 = vrot.lane.b32.xlu0 %v2982_v46, %s3263_s13 }
 0x21d   :  { %v2984_v47 = vpop.eup %2983 }
 0x21e   :  { %298 = vrot.lane.b32.xlu1 %v2984_v47, %s3263_s13 }
 0x28c   :  { %v301_v48 = vpop.permute.xlu0 %300 }
 0x28d   :  { %v305_v49 = vmul.f32 %v2978_v34, %v301_v48 }
 0x28f   :  { %v308_v51 = vrot.slane %v305_v49, 7 }
 0x290   :  { %v299_v50 = vpop.permute.xlu1 %298 }
 0x291   :  { %v304_v52 = vmul.f32 %v2980_v37, %v299_v50 }
 0x293   :  { %v310_v53 = vsel %vm309_vm2, %v308_v51, %v304_v52 }
 0x294   :  { %311 = vrot.lane.b32.xlu0 %v310_v53, %s3264_s3 }
 0x306   :  { %v312_v54 = vpop.permute.xlu0 %311 }
 0x307   :  { %315 = vst.msk [vmem:[#allocation2] sm:$0x3] %vm314_vm3, %v312_v54  ;;  %2652 = vmatmul.mubr.msk.f32.vlgmr.msra.gmra.mrb[2].mxu0 %vm93_vm1, %v312_v54  ;;  %vm1346_vm3 = vcmask 253952  }
 0x308   :  { %2865 = vmatpush3.bf16.msra.mxu0 %v3399_v9  ;;  %2673 = vmatprep.mubr.msk.f32.mxu0 %vm3261_vm0, %v3262_v1 }
 0x309   :  { %2866 = vmatprep.subr.bf16.mxu0 %v3260_v0 }
 0x30c   :  { %2868 = vmatpush3.bf16.msra.mxu0 %v3409_v14 }
 0x30d   :  { %2875 = vmatprep.subr.bf16.mxu0 %v3260_v0 }
 0x3da   :  { %v384_v55 = vpop.f32.mrb[2].mxu0 }
 0x3db   :  { %v389_v56 = vrot.slane %v384_v55, 7  ;;  %v393_v57 = vadd.f32 %v384_v55, %v3432_v20  ;;  %v2653_v58 = vpop.f32.mrb[3].mxu0 }
 0x3dd   :  { %v392_v59 = vadd.f32 %v389_v56, %v3434_v23  ;;  %2985 = vtanh.f32 %v393_v57  ;;  %v2480_v62 = vmul.f32 -1.442695, %v393_v57 }
 0x3df   :  { %2987 = vtanh.f32 %v392_v59  ;;  %v2479_v63 = vmul.f32 -1.442695, %v392_v59 }
 0x3e0   :  { %2989 = vpow2.f32 %v2480_v62 }
 0x3e1   :  { %2991 = vpow2.f32 %v2479_v63 }
 0x3e7   :  { %v2986_v60 = vpop.eup %2985 }
 0x3e8   :  { %420 = vrot.lane.b32.xlu0 %v2986_v60, %s3263_s13 }
 0x3e9   :  { %v2988_v61 = vpop.eup %2987 }
 0x3ea   :  { %418 = vrot.lane.b32.xlu1 %v2988_v61, %s3263_s13  ;;  %v2990_v2 = vpop.eup %2989 }
 0x3eb   :  { %v2992_v3 = vpop.eup %2991  ;;  %v401_v4 = vadd.f32 1.0, %v2990_v2 }
 0x3ec   :  { %v400_v5 = vadd.f32 1.0, %v2992_v3 }
 0x3ed   :  { %2993 = vrcp.f32 %v401_v4 }
 0x3ee   :  { %2995 = vrcp.f32 %v400_v5 }
 0x3f7   :  { %v2994_v6 = vpop.eup %2993 }
 0x3f8   :  { %v2996_v10 = vpop.eup %2995  ;;  %v415_v15 = vmul.f32 %v2994_v6, %v411_v13 }
 0x3f9   :  { %v414_v19 = vmul.f32 %v2996_v10, %v410_v16 }
 0x45a   :  { %v421_v7 = vpop.permute.xlu0 %420 }
 0x45b   :  { %v425_v8 = vmul.f32 %v2994_v6, %v421_v7 }
 0x45c   :  { %v419_v11 = vpop.permute.xlu1 %418 }
 0x45d   :  { %430 = vrot.lane.b32.xlu0 %v425_v8, %s3264_s3  ;;  %v424_v12 = vmul.f32 %v2996_v10, %v419_v11 }
 0x45f   :  { %428 = vrot.lane.b32.xlu1 %v424_v12, %s3264_s3 }
 0x4cf   :  { %v431_v17 = vpop.permute.xlu0 %430 }
 0x4d0   :  { %v435_v18 = vadd.f32 %v431_v17, %v415_v15 }
 0x4d1   :  { %v429_v21 = vpop.permute.xlu1 %428 }
 0x4d2   :  { %2997 = vtanh.f32 %v435_v18  ;;  %v434_v22 = vadd.f32 %v429_v21, %v414_v19  ;;  %v558_v56 = vrot.slane %v435_v18, 7 }
 0x4d4   :  { %2999 = vtanh.f32 %v434_v22  ;;  %v557_v55 = vrot.slane %v434_v22, 7 }
 0x4dc   :  { %v2998_v24 = vpop.eup %2997 }
 0x4dd   :  { %442 = vrot.lane.b32.xlu0 %v2998_v24, %s3263_s13 }
 0x4de   :  { %v3000_v25 = vpop.eup %2999 }
 0x4df   :  { %440 = vrot.lane.b32.xlu1 %v3000_v25, %s3263_s13 }
 0x54f   :  { %v443_v26 = vpop.permute.xlu0 %442 }
 0x550   :  { %v447_v27 = vmul.f32 %v2994_v6, %v443_v26 }
 0x551   :  { %v441_v29 = vpop.permute.xlu1 %440 }
 0x552   :  { %v450_v28 = vrot.slane %v447_v27, 7  ;;  %v446_v30 = vmul.f32 %v2996_v10, %v441_v29 }
 0x554   :  { %v458_v31 = vrot.slane %v446_v30, 1  ;;  %v3461_v32 = vsel %vm451_vm4, %v450_v28, %v446_v30  ;;  %vm2455_vm4 = vcmask 9216  }
 0x556   :  { %v459_v33 = vsel %vm309_vm2, %v447_v27, %v458_v31 }
 0x557   :  { %460 = vrot.lane.b32.xlu1 %v459_v33, %s3264_s3 }
 0x5c9   :  { %v461_v34 = vpop.permute.xlu1 %460 }
 0x5ca   :  { %2663 = vmatmul.mubr.msk.f32.vlgmr.msra.gmra.mrb[2].mxu1 %vm93_vm1, %v461_v34 }
 0x5cb   :  { %2871 = vmatpush3.bf16.msra.mxu1 %v3399_v9  ;;  %2684 = vmatprep.mubr.msk.f32.mxu1 %vm3261_vm0, %v3262_v1 }
 0x5cc   :  { %2872 = vmatprep.subr.bf16.mxu1 %v3260_v0 }
 0x5cf   :  { %2874 = vmatpush3.bf16.msra.mxu1 %v3409_v14 }
 0x5d0   :  { %2881 = vmatprep.subr.bf16.mxu1 %v3260_v0 }
 0x69d   :  { %v530_v35 = vpop.f32.mrb[2].mxu1 }
 0x69e   :  { %v535_v36 = vrot.slane %v530_v35, 6  ;;  %v536_v37 = vrot.slane %v530_v35, 7  ;;  %v2664_v38 = vpop.f32.mrb[3].mxu1 }
 0x6a0   :  { %v539_v39 = vadd.f32 %v535_v36, %v3434_v23  ;;  %v540_v40 = vadd.f32 %v536_v37, %v3432_v20 }
 0x6a2   :  { %3001 = vtanh.f32 %v539_v39  ;;  %v2482_v43 = vmul.f32 -1.442695, %v539_v39  ;;  %v2483_v44 = vmul.f32 -1.442695, %v540_v40 }
 0x6a3   :  { %3003 = vtanh.f32 %v540_v40 }
 0x6a4   :  { %3005 = vpow2.f32 %v2482_v43 }
 0x6a5   :  { %3007 = vpow2.f32 %v2483_v44 }
 0x6ac   :  { %v3002_v41 = vpop.eup %3001 }
 0x6ad   :  { %v3004_v42 = vpop.eup %3003  ;;  %565 = vrot.lane.b32.xlu0 %v3002_v41, %s3263_s13 }
 0x6ae   :  { %567 = vrot.lane.b32.xlu1 %v3004_v42, %s3263_s13  ;;  %v3006_v45 = vpop.eup %3005 }
 0x6af   :  { %v3008_v46 = vpop.eup %3007  ;;  %v547_v47 = vadd.f32 1.0, %v3006_v45 }
 0x6b0   :  { %v548_v48 = vadd.f32 1.0, %v3008_v46 }
 0x6b1   :  { %3009 = vrcp.f32 %v547_v47 }
 0x6b2   :  { %3011 = vrcp.f32 %v548_v48 }
 0x6bb   :  { %v3010_v49 = vpop.eup %3009 }
 0x6bc   :  { %v3012_v51 = vpop.eup %3011  ;;  %v561_v57 = vmul.f32 %v3010_v49, %v557_v55 }
 0x6bd   :  { %v562_v58 = vmul.f32 %v3012_v51, %v558_v56 }
 0x71f   :  { %v566_v50 = vpop.permute.xlu0 %565 }
 0x720   :  { %v568_v52 = vpop.permute.xlu1 %567  ;;  %v571_v53 = vmul.f32 %v3010_v49, %v566_v50 }
 0x721   :  { %v572_v54 = vmul.f32 %v3012_v51, %v568_v52 }
 0x722   :  { %575 = vrot.lane.b32.xlu0 %v571_v53, %s3264_s3 }
 0x723   :  { %577 = vrot.lane.b32.xlu1 %v572_v54, %s3264_s3 }
 0x794   :  { %v576_v59 = vpop.permute.xlu0 %575 }
 0x795   :  { %v578_v60 = vpop.permute.xlu1 %577  ;;  %v581_v61 = vadd.f32 %v576_v59, %v561_v57 }
 0x796   :  { %v582_v62 = vadd.f32 %v578_v60, %v562_v58 }
 0x797   :  { %3013 = vtanh.f32 %v581_v61  ;;  %v705_v38 = vrot.slane %v581_v61, 7 }
 0x798   :  { %3015 = vtanh.f32 %v582_v62  ;;  %v706_v39 = vrot.slane %v582_v62, 7 }
 0x7a1   :  { %v3014_v63 = vpop.eup %3013 }
 0x7a2   :  { %v3016_v2 = vpop.eup %3015  ;;  %587 = vrot.lane.b32.xlu0 %v3014_v63, %s3263_s13 }
 0x7a3   :  { %589 = vrot.lane.b32.xlu1 %v3016_v2, %s3263_s13 }
 0x814   :  { %v588_v3 = vpop.permute.xlu0 %587 }
 0x815   :  { %v590_v4 = vpop.permute.xlu1 %589  ;;  %v593_v5 = vmul.f32 %v3010_v49, %v588_v3 }
 0x816   :  { %v594_v6 = vmul.f32 %v3012_v51, %v590_v4 }
 0x817   :  { %v605_v7 = vrot.slane %v593_v5, 2 }
 0x818   :  { %v597_v8 = vrot.slane %v594_v6, 7  ;;  %v606_v10 = vrot.slane %v594_v6, 1 }
 0x81a   :  { %v607_v11 = vsel %vm309_vm2, %v606_v10, %v605_v7  ;;  %v3481_v12 = vsel %vm598_vm5, %v597_v8, %v593_v5 }
 0x81b   :  { %608 = vrot.lane.b32.xlu0 %v607_v11, %s3264_s3 }
 0x88d   :  { %v609_v13 = vpop.permute.xlu0 %608 }
 0x88e   :  { %2674 = vmatmul.mubr.msk.f32.vlgmr.msra.gmra.mrb[4].mxu0 %vm93_vm1, %v609_v13 }
 0x88f   :  { %2877 = vmatpush3.bf16.msra.mxu0 %v3399_v9  ;;  %2695 = vmatprep.mubr.msk.f32.mxu0 %vm3261_vm0, %v3262_v1 }
 0x890   :  { %2878 = vmatprep.subr.bf16.mxu0 %v3260_v0 }
 0x893   :  { %2880 = vmatpush3.bf16.msra.mxu0 %v3409_v14 }
 0x894   :  { %2887 = vmatprep.subr.bf16.mxu0 %v3260_v0 }
 0x961   :  { %v678_v15 = vpop.f32.mrb[4].mxu0 }
 0x962   :  { %v683_v16 = vrot.slane %v678_v15, 5  ;;  %v684_v17 = vrot.slane %v678_v15, 6  ;;  %v2675_v18 = vpop.f32.mrb[5].mxu0 }
 0x964   :  { %v687_v19 = vadd.f32 %v683_v16, %v3434_v23  ;;  %v688_v21 = vadd.f32 %v684_v17, %v3432_v20 }
 0x966   :  { %3017 = vtanh.f32 %v687_v19  ;;  %v2485_v25 = vmul.f32 -1.442695, %v687_v19  ;;  %v2486_v26 = vmul.f32 -1.442695, %v688_v21 }
 0x967   :  { %3019 = vtanh.f32 %v688_v21 }
 0x968   :  { %3021 = vpow2.f32 %v2485_v25 }
 0x969   :  { %3023 = vpow2.f32 %v2486_v26 }
 0x970   :  { %v3018_v22 = vpop.eup %3017 }
 0x971   :  { %v3020_v24 = vpop.eup %3019  ;;  %713 = vrot.lane.b32.xlu1 %v3018_v22, %s3263_s13 }
 0x972   :  { %715 = vrot.lane.b32.xlu0 %v3020_v24, %s3263_s13  ;;  %v3022_v27 = vpop.eup %3021 }
 0x973   :  { %v3024_v28 = vpop.eup %3023  ;;  %v695_v29 = vadd.f32 1.0, %v3022_v27 }
 0x974   :  { %v696_v30 = vadd.f32 1.0, %v3024_v28 }
 0x975   :  { %3025 = vrcp.f32 %v695_v29 }
 0x976   :  { %3027 = vrcp.f32 %v696_v30 }
 0x97f   :  { %v3026_v31 = vpop.eup %3025 }
 0x980   :  { %v3028_v34 = vpop.eup %3027  ;;  %v709_v40 = vmul.f32 %v3026_v31, %v705_v38 }
 0x981   :  { %v710_v41 = vmul.f32 %v3028_v34, %v706_v39 }
 0x9e3   :  { %v714_v33 = vpop.permute.xlu1 %713 }
 0x9e4   :  { %v716_v35 = vpop.permute.xlu0 %715  ;;  %v719_v36 = vmul.f32 %v3026_v31, %v714_v33 }
 0x9e5   :  { %v720_v37 = vmul.f32 %v3028_v34, %v716_v35 }
 0x9e6   :  { %723 = vrot.lane.b32.xlu1 %v719_v36, %s3264_s3 }
 0x9e7   :  { %725 = vrot.lane.b32.xlu0 %v720_v37, %s3264_s3 }
 0xa58   :  { %v724_v42 = vpop.permute.xlu1 %723 }
 0xa59   :  { %v726_v43 = vpop.permute.xlu0 %725  ;;  %v729_v44 = vadd.f32 %v724_v42, %v709_v40 }
 0xa5a   :  { %v730_v45 = vadd.f32 %v726_v43, %v710_v41 }
 0xa5b   :  { %3029 = vtanh.f32 %v729_v44  ;;  %v853_v19 = vrot.slane %v729_v44, 7 }
 0xa5c   :  { %3031 = vtanh.f32 %v730_v45  ;;  %v854_v21 = vrot.slane %v730_v45, 7 }
 0xa65   :  { %v3030_v46 = vpop.eup %3029 }
 0xa66   :  { %v3032_v47 = vpop.eup %3031  ;;  %735 = vrot.lane.b32.xlu1 %v3030_v46, %s3263_s13 }
 0xa67   :  { %737 = vrot.lane.b32.xlu0 %v3032_v47, %s3263_s13 }
 0xad8   :  { %v736_v48 = vpop.permute.xlu1 %735 }
 0xad9   :  { %v738_v49 = vpop.permute.xlu0 %737  ;;  %v741_v50 = vmul.f32 %v3026_v31, %v736_v48 }
 0xada   :  { %v742_v51 = vmul.f32 %v3028_v34, %v738_v49 }
 0xadb   :  { %v753_v52 = vrot.slane %v741_v50, 3 }
 0xadc   :  { %v745_v53 = vrot.slane %v742_v51, 7  ;;  %v754_v54 = vrot.slane %v742_v51, 2 }
 0xade   :  { %v755_v55 = vsel %vm309_vm2, %v754_v54, %v753_v52  ;;  %v3500_v56 = vsel %vm746_vm6, %v745_v53, %v741_v50 }
 0xadf   :  { %756 = vrot.lane.b32.xlu1 %v755_v55, %s3264_s3 }
 0xb51   :  { %v757_v57 = vpop.permute.xlu1 %756 }
 0xb52   :  { %2685 = vmatmul.mubr.msk.f32.vlgmr.msra.gmra.mrb[4].mxu1 %vm93_vm1, %v757_v57 }
 0xb53   :  { %2883 = vmatpush3.bf16.msra.mxu1 %v3399_v9  ;;  %2706 = vmatprep.mubr.msk.f32.mxu1 %vm3261_vm0, %v3262_v1 }
 0xb54   :  { %2884 = vmatprep.subr.bf16.mxu1 %v3260_v0 }
 0xb57   :  { %2886 = vmatpush3.bf16.msra.mxu1 %v3409_v14 }
 0xc25   :  { %v826_v58 = vpop.f32.mrb[4].mxu1 }
 0xc26   :  { %v831_v59 = vrot.slane %v826_v58, 4  ;;  %v832_v60 = vrot.slane %v826_v58, 5  ;;  %v2686_v61 = vpop.f32.mrb[5].mxu1 }
 0xc28   :  { %v835_v62 = vadd.f32 %v831_v59, %v3434_v23  ;;  %v836_v63 = vadd.f32 %v832_v60, %v3432_v20 }
 0xc2a   :  { %3033 = vtanh.f32 %v835_v62  ;;  %v2488_v4 = vmul.f32 -1.442695, %v835_v62  ;;  %v2489_v5 = vmul.f32 -1.442695, %v836_v63 }
 0xc2b   :  { %3035 = vtanh.f32 %v836_v63 }
 0xc2c   :  { %3037 = vpow2.f32 %v2488_v4 }
 0xc2d   :  { %3039 = vpow2.f32 %v2489_v5 }
 0xc34   :  { %v3034_v2 = vpop.eup %3033 }
 0xc35   :  { %v3036_v3 = vpop.eup %3035  ;;  %861 = vrot.lane.b32.xlu0 %v3034_v2, %s3263_s13 }
 0xc36   :  { %863 = vrot.lane.b32.xlu1 %v3036_v3, %s3263_s13  ;;  %v3038_v6 = vpop.eup %3037 }
 0xc37   :  { %v3040_v7 = vpop.eup %3039  ;;  %v843_v8 = vadd.f32 1.0, %v3038_v6 }
 0xc38   :  { %v844_v10 = vadd.f32 1.0, %v3040_v7 }
 0xc39   :  { %3041 = vrcp.f32 %v843_v8 }
 0xc3a   :  { %3043 = vrcp.f32 %v844_v10 }
 0xc43   :  { %v3042_v11 = vpop.eup %3041 }
 0xc44   :  { %v3044_v15 = vpop.eup %3043  ;;  %v857_v22 = vmul.f32 %v3042_v11, %v853_v19 }
 0xc45   :  { %v858_v24 = vmul.f32 %v3044_v15, %v854_v21 }
 0xca7   :  { %v862_v13 = vpop.permute.xlu0 %861 }
 0xca8   :  { %v864_v16 = vpop.permute.xlu1 %863  ;;  %v867_v17 = vmul.f32 %v3042_v11, %v862_v13 }
 0xca9   :  { %v868_v18 = vmul.f32 %v3044_v15, %v864_v16 }
 0xcaa   :  { %871 = vrot.lane.b32.xlu0 %v867_v17, %s3264_s3 }
 0xcab   :  { %873 = vrot.lane.b32.xlu1 %v868_v18, %s3264_s3 }
 0xd1c   :  { %v872_v25 = vpop.permute.xlu0 %871 }
 0xd1d   :  { %v874_v26 = vpop.permute.xlu1 %873  ;;  %v877_v27 = vadd.f32 %v872_v25, %v857_v22 }
 0xd1e   :  { %v878_v28 = vadd.f32 %v874_v26, %v858_v24 }
 0xd1f   :  { %3045 = vtanh.f32 %v877_v27  ;;  %v1001_v61 = vrot.slane %v877_v27, 7 }
 0xd20   :  { %3047 = vtanh.f32 %v878_v28  ;;  %v1002_v62 = vrot.slane %v878_v28, 7 }
 0xd29   :  { %v3046_v29 = vpop.eup %3045 }
 0xd2a   :  { %v3048_v30 = vpop.eup %3047  ;;  %883 = vrot.lane.b32.xlu0 %v3046_v29, %s3263_s13 }
 0xd2b   :  { %885 = vrot.lane.b32.xlu1 %v3048_v30, %s3263_s13 }
 0xd9c   :  { %v884_v31 = vpop.permute.xlu0 %883 }
 0xd9d   :  { %v886_v33 = vpop.permute.xlu1 %885  ;;  %v889_v34 = vmul.f32 %v3042_v11, %v884_v31 }
 0xd9e   :  { %v890_v35 = vmul.f32 %v3044_v15, %v886_v33 }
 0xd9f   :  { %v901_v36 = vrot.slane %v889_v34, 4 }
 0xda0   :  { %v893_v37 = vrot.slane %v890_v35, 7  ;;  %v902_v38 = vrot.slane %v890_v35, 3 }
 0xda2   :  { %v903_v39 = vsel %vm309_vm2, %v902_v38, %v901_v36  ;;  %v3518_v40 = vsel %vm894_vm7, %v893_v37, %v889_v34 }
 0xda3   :  { %904 = vrot.lane.b32.xlu0 %v903_v39, %s3264_s3 }
 0xe15   :  { %v905_v41 = vpop.permute.xlu0 %904 }
 0xe16   :  { %2696 = vmatmul.mubr.msk.f32.vlgmr.msra.gmra.mrb[6].mxu0 %vm93_vm1, %v905_v41 }
 0xe17   :  { %2889 = vmatpush3.bf16.msra.mxu0 %v3399_v9  ;;  %2717 = vmatprep.mubr.msk.f32.mxu0 %vm3261_vm0, %v3262_v1 }
 0xe18   :  { %2890 = vmatprep.subr.bf16.mxu0 %v3260_v0 }
 0xe1b   :  { %2892 = vmatpush3.bf16.msra.mxu0 %v3409_v14 }
 0xe1c   :  { %2901 = vmatprep.subr.bf16.mxu0 %v3260_v0 }
 0xee9   :  { %v974_v42 = vpop.f32.mrb[6].mxu0 }
 0xeea   :  { %v979_v43 = vrot.slane %v974_v42, 3  ;;  %v980_v44 = vrot.slane %v974_v42, 4  ;;  %v2697_v45 = vpop.f32.mrb[7].mxu0 }
 0xeec   :  { %v983_v46 = vadd.f32 %v979_v43, %v3434_v23  ;;  %v984_v47 = vadd.f32 %v980_v44, %v3432_v20 }
 0xeee   :  { %3049 = vtanh.f32 %v983_v46  ;;  %v2491_v49 = vmul.f32 -1.442695, %v983_v46  ;;  %v2492_v14 = vmul.f32 -1.442695, %v984_v47 }
 0xeef   :  { %3051 = vtanh.f32 %v984_v47 }
 0xef0   :  { %3053 = vpow2.f32 %v2491_v49 }
 0xef1   :  { %3055 = vpow2.f32 %v2492_v14 }
 0xef8   :  { %v3050_v9 = vpop.eup %3049 }
 0xef9   :  { %v3052_v48 = vpop.eup %3051  ;;  %1009 = vrot.lane.b32.xlu1 %v3050_v9, %s3263_s13 }
 0xefa   :  { %1011 = vrot.lane.b32.xlu0 %v3052_v48, %s3263_s13  ;;  %v3054_v50 = vpop.eup %3053 }
 0xefb   :  { %v3056_v51 = vpop.eup %3055  ;;  %v991_v52 = vadd.f32 1.0, %v3054_v50 }
 0xefc   :  { %v992_v53 = vadd.f32 1.0, %v3056_v51 }
 0xefd   :  { %3057 = vrcp.f32 %v991_v52 }
 0xefe   :  { %3059 = vrcp.f32 %v992_v53 }
 0xf07   :  { %v3058_v54 = vpop.eup %3057 }
 0xf08   :  { %v3060_v57 = vpop.eup %3059  ;;  %v1005_v63 = vmul.f32 %v3058_v54, %v1001_v61 }
 0xf09   :  { %v1006_v2 = vmul.f32 %v3060_v57, %v1002_v62 }
 0xf6b   :  { %v1010_v55 = vpop.permute.xlu1 %1009 }
 0xf6c   :  { %v1012_v58 = vpop.permute.xlu0 %1011  ;;  %v1015_v59 = vmul.f32 %v3058_v54, %v1010_v55 }
 0xf6d   :  { %v1016_v60 = vmul.f32 %v3060_v57, %v1012_v58 }
 0xf6e   :  { %1019 = vrot.lane.b32.xlu1 %v1015_v59, %s3264_s3 }
 0xf6f   :  { %1021 = vrot.lane.b32.xlu0 %v1016_v60, %s3264_s3 }
 0xfe0   :  { %v1020_v3 = vpop.permute.xlu1 %1019 }
 0xfe1   :  { %v1022_v4 = vpop.permute.xlu0 %1021  ;;  %v1025_v5 = vadd.f32 %v1020_v3, %v1005_v63 }
 0xfe2   :  { %v1026_v6 = vadd.f32 %v1022_v4, %v1006_v2 }
 0xfe3   :  { %3061 = vtanh.f32 %v1025_v5  ;;  %v1149_v46 = vrot.slane %v1025_v5, 7 }
 0xfe4   :  { %3063 = vtanh.f32 %v1026_v6  ;;  %v1150_v47 = vrot.slane %v1026_v6, 7 }
 0xfed   :  { %v3062_v7 = vpop.eup %3061 }
 0xfee   :  { %v3064_v8 = vpop.eup %3063  ;;  %1031 = vrot.lane.b32.xlu1 %v3062_v7, %s3263_s13 }
 0xfef   :  { %1033 = vrot.lane.b32.xlu0 %v3064_v8, %s3263_s13 }
0x1060   :  { %v1032_v10 = vpop.permute.xlu1 %1031 }
0x1061   :  { %v1034_v11 = vpop.permute.xlu0 %1033  ;;  %v1037_v13 = vmul.f32 %v3058_v54, %v1032_v10 }
0x1062   :  { %v1038_v15 = vmul.f32 %v3060_v57, %v1034_v11 }
0x1063   :  { %v1049_v16 = vrot.slane %v1037_v13, 5 }
0x1064   :  { %v1041_v17 = vrot.slane %v1038_v15, 7  ;;  %v1050_v18 = vrot.slane %v1038_v15, 4 }
0x1066   :  { %v1051_v19 = vsel %vm309_vm2, %v1050_v18, %v1049_v16  ;;  %v3537_v21 = vsel %vm1042_vm8, %v1041_v17, %v1037_v13 }
0x1067   :  { %1052 = vrot.lane.b32.xlu1 %v1051_v19, %s3264_s3 }
0x10d9   :  { %v1053_v22 = vpop.permute.xlu1 %1052 }
0x10da   :  { %2707 = vmatmul.mubr.msk.f32.vlgmr.msra.gmra.mrb[6].mxu1 %vm93_vm1, %v1053_v22 }
0x11ad   :  { %v1122_v24 = vpop.f32.mrb[6].mxu1 }
0x11ae   :  { %v1127_v25 = vrot.slane %v1122_v24, 2  ;;  %v1128_v26 = vrot.slane %v1122_v24, 3  ;;  %v2708_v27 = vpop.f32.mrb[7].mxu1 }
0x11b0   :  { %v1131_v28 = vadd.f32 %v1127_v25, %v3434_v23  ;;  %v1132_v29 = vadd.f32 %v1128_v26, %v3432_v20 }
0x11b2   :  { %3065 = vtanh.f32 %v1131_v28  ;;  %v2494_v33 = vmul.f32 -1.442695, %v1131_v28  ;;  %v2495_v34 = vmul.f32 -1.442695, %v1132_v29 }
0x11b3   :  { %3067 = vtanh.f32 %v1132_v29 }
0x11b4   :  { %3069 = vpow2.f32 %v2494_v33 }
0x11b5   :  { %3071 = vpow2.f32 %v2495_v34 }
0x11bc   :  { %v3066_v30 = vpop.eup %3065 }
0x11bd   :  { %v3068_v31 = vpop.eup %3067  ;;  %1157 = vrot.lane.b32.xlu0 %v3066_v30, %s3263_s13 }
0x11be   :  { %1159 = vrot.lane.b32.xlu1 %v3068_v31, %s3263_s13  ;;  %v3070_v35 = vpop.eup %3069 }
0x11bf   :  { %v3072_v36 = vpop.eup %3071  ;;  %v1139_v37 = vadd.f32 1.0, %v3070_v35 }
0x11c0   :  { %v1140_v38 = vadd.f32 1.0, %v3072_v36 }
0x11c1   :  { %3073 = vrcp.f32 %v1139_v37 }
0x11c2   :  { %3075 = vrcp.f32 %v1140_v38  ;;  %v1350_v38 = vld [vmem:[#allocation6] sm:$0xff] }
0x11cb   :  { %v3074_v39 = vpop.eup %3073 }
0x11cc   :  { %v3076_v42 = vpop.eup %3075  ;;  %v1153_v9 = vmul.f32 %v3074_v39, %v1149_v46 }
0x11cd   :  { %v1154_v48 = vmul.f32 %v3076_v42, %v1150_v47 }
0x122f   :  { %v1158_v41 = vpop.permute.xlu0 %1157 }
0x1230   :  { %v1160_v43 = vpop.permute.xlu1 %1159  ;;  %v1163_v44 = vmul.f32 %v3074_v39, %v1158_v41 }
0x1231   :  { %v1164_v45 = vmul.f32 %v3076_v42, %v1160_v43  ;;  %v1352_v43 = vld [vmem:[#allocation6 + $0x10] sm:$0xff] }
0x1232   :  { %1167 = vrot.lane.b32.xlu0 %v1163_v44, %s3264_s3  ;;  %v1353_v44 = vld [vmem:[#allocation6 + $0x18] sm:$0xff] }
0x1233   :  { %1169 = vrot.lane.b32.xlu1 %v1164_v45, %s3264_s3  ;;  %v1445_v45 = vld [vmem:[#allocation8 + $0x18] sm:$0xff]  ;;  %v2897_v46 = vpack.c.bf16 %v1353_v44, %v1352_v43 }
0x12a4   :  { %v1168_v49 = vpop.permute.xlu0 %1167 }
0x12a5   :  { %v1170_v14 = vpop.permute.xlu1 %1169  ;;  %v1173_v50 = vadd.f32 %v1168_v49, %v1153_v9 }
0x12a6   :  { %v1174_v51 = vadd.f32 %v1170_v14, %v1154_v48 }
0x12a7   :  { %3077 = vtanh.f32 %v1173_v50  ;;  %v1297_v27 = vrot.slane %v1173_v50, 7 }
0x12a8   :  { %3079 = vtanh.f32 %v1174_v51  ;;  %v1298_v28 = vrot.slane %v1174_v51, 7 }
0x12b1   :  { %v3078_v52 = vpop.eup %3077 }
0x12b2   :  { %v3080_v53 = vpop.eup %3079  ;;  %1179 = vrot.lane.b32.xlu0 %v3078_v52, %s3263_s13 }
0x12b3   :  { %1181 = vrot.lane.b32.xlu1 %v3080_v53, %s3263_s13 }
0x1324   :  { %v1180_v54 = vpop.permute.xlu0 %1179 }
0x1325   :  { %v1182_v55 = vpop.permute.xlu1 %1181  ;;  %v1185_v57 = vmul.f32 %v3074_v39, %v1180_v54  ;;  %v1351_v39 = vld [vmem:[#allocation6 + $0x8] sm:$0xff] }
0x1326   :  { %v1186_v58 = vmul.f32 %v3076_v42, %v1182_v55  ;;  %v2893_v41 = vpack.c.bf16 %v1351_v39, %v1350_v38  ;;  %v1442_v42 = vld [vmem:[#allocation8] sm:$0xff] }
0x1327   :  { %v1197_v59 = vrot.slane %v1185_v57, 6 }
0x1328   :  { %v1189_v60 = vrot.slane %v1186_v58, 7  ;;  %v1198_v61 = vrot.slane %v1186_v58, 5  ;;  %2894 = vmatprep.subr.bf16.mxu1 %v2893_v41 }
0x1329   :  { %2896 = vmatpush3.bf16.msra.mxu1 %v2893_v41 }
0x132a   :  { %v1199_v62 = vsel %vm309_vm2, %v1198_v61, %v1197_v59  ;;  %v1191_v63 = vsel %vm1190_vm9, %v1189_v60, %v1185_v57  ;;  %2898 = vmatprep.subr.bf16.mxu1 %v2897_v46  ;;  %vm1344_vm2 = vcmask 261127  }
0x132b   :  { %1200 = vrot.lane.b32.xlu0 %v1199_v62, %s3264_s3  ;;  %v2499_v62 = vld [vmem:[%s3731_s6] ss:$0 sm:$0xff] }
0x132d   :  { %2900 = vmatpush3.bf16.msra.mxu1 %v2897_v46 }
0x132e   :  { %2907 = vmatprep.subr.bf16.mxu1 %v3260_v0 }
0x139d   :  { %v1201_v2 = vpop.permute.xlu0 %1200 }
0x139e   :  { %2718 = vmatmul.mubr.msk.f32.vlgmr.msra.gmra.mrb[8].mxu0 %vm93_vm1, %v1201_v2 }
0x139f   :  { %2739 = vmatprep.mubr.msk.f32.mxu0 %vm3261_vm0, %v3262_v1 }
0x1471   :  { %v1270_v3 = vpop.f32.mrb[8].mxu0 }
0x1472   :  { %v1275_v4 = vrot.slane %v1270_v3, 1  ;;  %v1276_v5 = vrot.slane %v1270_v3, 2  ;;  %v2719_v6 = vpop.f32.mrb[9].mxu0 }
0x1474   :  { %v1279_v7 = vadd.f32 %v1275_v4, %v3434_v23  ;;  %v1280_v8 = vadd.f32 %v1276_v5, %v3432_v20 }
0x1476   :  { %3081 = vtanh.f32 %v1279_v7  ;;  %v2497_v13 = vmul.f32 -1.442695, %v1279_v7  ;;  %v2498_v15 = vmul.f32 -1.442695, %v1280_v8 }
0x1477   :  { %3083 = vtanh.f32 %v1280_v8 }
0x1478   :  { %3085 = vpow2.f32 %v2497_v13 }
0x1479   :  { %3087 = vpow2.f32 %v2498_v15 }
0x1480   :  { %v3082_v10 = vpop.eup %3081 }
0x1481   :  { %v3084_v11 = vpop.eup %3083  ;;  %1305 = vrot.lane.b32.xlu0 %v3082_v10, %s3263_s13 }
0x1482   :  { %1307 = vrot.lane.b32.xlu1 %v3084_v11, %s3263_s13  ;;  %v3086_v16 = vpop.eup %3085 }
0x1483   :  { %v3088_v17 = vpop.eup %3087  ;;  %v1287_v18 = vadd.f32 1.0, %v3086_v16 }
0x1484   :  { %v1288_v19 = vadd.f32 1.0, %v3088_v17 }
0x1485   :  { %3089 = vrcp.f32 %v1287_v18 }
0x1486   :  { %3091 = vrcp.f32 %v1288_v19 }
0x148f   :  { %v3090_v23 = vpop.eup %3089 }
0x1490   :  { %v3092_v22 = vpop.eup %3091  ;;  %v1301_v29 = vmul.f32 %v3090_v23, %v1297_v27 }
0x1491   :  { %v1302_v30 = vmul.f32 %v3092_v22, %v1298_v28 }
0x14f3   :  { %v1306_v20 = vpop.permute.xlu0 %1305 }
0x14f4   :  { %v1308_v24 = vpop.permute.xlu1 %1307  ;;  %v1311_v25 = vmul.f32 %v3090_v23, %v1306_v20 }
0x14f5   :  { %v1312_v26 = vmul.f32 %v3092_v22, %v1308_v24 }
0x14f6   :  { %1315 = vrot.lane.b32.xlu0 %v1311_v25, %s3264_s3 }
0x14f7   :  { %1317 = vrot.lane.b32.xlu1 %v1312_v26, %s3264_s3 }
0x1568   :  { %v1316_v31 = vpop.permute.xlu0 %1315 }
0x1569   :  { %v1318_v33 = vpop.permute.xlu1 %1317  ;;  %v1321_v34 = vadd.f32 %v1316_v31, %v1301_v29 }
0x156a   :  { %v1322_v35 = vadd.f32 %v1318_v33, %v1302_v30 }
0x156b   :  { %3093 = vtanh.f32 %v1321_v34 }
0x156c   :  { %3095 = vtanh.f32 %v1322_v35 }
0x1575   :  { %v3094_v36 = vpop.eup %3093 }
0x1576   :  { %v3096_v37 = vpop.eup %3095  ;;  %1327 = vrot.lane.b32.xlu0 %v3094_v36, %s3263_s13 }
0x1577   :  { %1329 = vrot.lane.b32.xlu1 %v3096_v37, %s3263_s13 }
0x157a   :  { %600 = vrot.lane.b32.xlu0 %v3481_v12, %s3264_s3  ;;  %v1443_v12 = vld [vmem:[#allocation8 + $0x8] sm:$0xff] }
0x157b   :  { %453 = vrot.lane.b32.xlu1 %v3461_v32, %s3264_s3  ;;  %v3573_v32 = vpack.c.bf16 %v1443_v12, %v1442_v42 }
0x157d   :  { %2903 = vmatpush3.bf16.msra.mxu0 %v3573_v32 }
0x157e   :  { %896 = vrot.lane.b32.xlu0 %v3518_v40, %s3264_s3  ;;  %v1444_v40 = vld [vmem:[#allocation8 + $0x10] sm:$0xff]  ;;  %2904 = vmatprep.subr.bf16.mxu0 %v3260_v0 }
0x157f   :  { %748 = vrot.lane.b32.xlu1 %v3500_v56, %s3264_s3  ;;  %v3576_v56 = vpack.c.bf16 %v1445_v45, %v1444_v40 }
0x1581   :  { %2906 = vmatpush3.bf16.msra.mxu0 %v3576_v56 }
0x1582   :  { %1192 = vrot.lane.b32.xlu0 %v1191_v63, %s3264_s3  ;;  %2913 = vmatprep.subr.bf16.mxu0 %v3260_v0 }
0x1583   :  { %1044 = vrot.lane.b32.xlu1 %v3537_v21, %s3264_s3 }
0x1584   :  { %2740 = vmatmul.mubr.f32.vlgmr.msra.gmra.mrb[10].mxu0 %v3262_v1 }
0x1585   :  { %2915 = vmatpush3.bf16.msra.mxu0 %v3573_v32  ;;  %2761 = vmatprep.mubr.msk.f32.mxu0 %vm3261_vm0, %v3262_v1 }
0x1586   :  { %2916 = vmatprep.subr.bf16.mxu0 %v3260_v0 }
0x1589   :  { %2918 = vmatpush3.bf16.msra.mxu0 %v3576_v56 }
0x158a   :  { %2925 = vmatprep.subr.bf16.mxu0 %v3260_v0 }
0x15e8   :  { %v1328_v21 = vpop.permute.xlu0 %1327 }
0x15e9   :  { %v1330_v47 = vpop.permute.xlu1 %1329  ;;  %v1333_v9 = vmul.f32 %v3090_v23, %v1328_v21 }
0x15ea   :  { %v1334_v48 = vmul.f32 %v3092_v22, %v1330_v47 }
0x15eb   :  { %1338 = vrot.lane.b32.xlu1 %v1333_v9, %s3264_s3 }
0x15ec   :  { %v1337_v49 = vrot.slane %v1334_v48, 7  ;;  %v601_v14 = vpop.permute.xlu0 %600 }
0x15ed   :  { %v454_v50 = vpop.permute.xlu1 %453  ;;  %604 = vst.msk [vmem:[#allocation2 + $0x2] sm:$0xc] %vm603_vm10, %v601_v14 }
0x15ee   :  { %457 = vst.msk [vmem:[#allocation2 + $0x1] sm:$0x6] %vm456_vm11, %v454_v50  ;;  %1340 = vrot.lane.b32.xlu0 %v1337_v49, %s3264_s3 }
0x15f0   :  { %v897_v51 = vpop.permute.xlu0 %896 }
0x15f1   :  { %v749_v52 = vpop.permute.xlu1 %748  ;;  %900 = vst.msk [vmem:[#allocation2 + $0x4] sm:$0x30] %vm899_vm12, %v897_v51 }
0x15f2   :  { %752 = vst.msk [vmem:[#allocation2 + $0x3] sm:$0x18] %vm751_vm13, %v749_v52 }
0x15f4   :  { %v1193_v53 = vpop.permute.xlu0 %1192 }
0x15f5   :  { %v1045_v54 = vpop.permute.xlu1 %1044  ;;  %1196 = vst.msk [vmem:[#allocation2 + $0x6] sm:$0xc0] %vm1195_vm14, %v1193_v53 }
0x15f6   :  { %1048 = vst.msk [vmem:[#allocation2 + $0x5] sm:$0x60] %vm1047_vm15, %v1045_v54 }
0x15f9   :  { %v1348_v55 = vld [vmem:[#allocation2] sm:$0xff] }
0x15fa   :  { %2728 = vmatprep.mubr.msk.f32.mxu1 %vm93_vm1, %v1348_v55 }
0x1657   :  { %v1512_v60 = vpop.f32.mrb[10].mxu0 }
0x1658   :  { %v2741_v61 = vpop.f32.mrb[11].mxu0 }
0x165d   :  { %v1339_v57 = vpop.permute.xlu1 %1338 }
0x165e   :  { %1345 = vst.msk [vmem:[#allocation2 + $0x7] sm:$0x80] %vm1344_vm2, %v1339_v57 }
0x1660   :  { %v1341_v58 = vpop.permute.xlu0 %1340 }
0x1661   :  { %1347 = vst.msk [vmem:[#allocation2 + $0xf] sm:$0x1] %vm1346_vm3, %v1341_v58 }
0x1668   :  { %v1349_v59 = vld [vmem:[#allocation2 + $0x8] sm:$0xff] }
0x1669   :  { %2729 = vmatmul.mubr.msk.f32.vlgmr.msra.gmra.mrb[8].mxu1 %vm93_vm1, %v1349_v59 }
0x166a   :  { %2909 = vmatpush3.bf16.msra.mxu1 %v3573_v32  ;;  %2750 = vmatprep.mubr.msk.f32.mxu1 %vm3261_vm0, %v3262_v1 }
0x166b   :  { %2910 = vmatprep.subr.bf16.mxu1 %v3260_v0 }
0x166e   :  { %2912 = vmatpush3.bf16.msra.mxu1 %v3576_v56 }
0x166f   :  { %2919 = vmatprep.subr.bf16.mxu1 %v3260_v0 }
0x173c   :  { %v2730_v63 = vpop.f32.mrb[8].mxu1 }
0x173d   :  { %v3602_v2 = vadd.f32 %v2730_v63, %v2499_v62  ;;  %v1433_v3 = vpop.f32.mrb[9].mxu1 }
0x173e   :  { %v3604_v4 = vadd.f32 %v2499_v62, %v1433_v3 }
0x1740   :  { %v1516_v5 = vadd.f32 %v1512_v60, %v3604_v4 }
0x1742   :  { %3097 = vtanh.f32 %v1516_v5  ;;  %v2502_v7 = vmul.f32 -1.442695, %v1516_v5 }
0x1744   :  { %3099 = vpow2.f32 %v2502_v7 }
0x174c   :  { %v3098_v6 = vpop.eup %3097 }
0x174d   :  { %1526 = vrot.lane.b32.xlu1 %v3098_v6, %s3263_s13 }
0x174e   :  { %v3100_v8 = vpop.eup %3099 }
0x174f   :  { %v1520_v10 = vadd.f32 1.0, %v3100_v8 }
0x1751   :  { %3101 = vrcp.f32 %v1520_v10 }
0x175b   :  { %v3102_v11 = vpop.eup %3101 }
0x175c   :  { %v1524_v16 = vmul.f32 0.0, %v3102_v11 }
0x17bf   :  { %v1527_v13 = vpop.permute.xlu1 %1526 }
0x17c0   :  { %v1529_v15 = vmul.f32 %v3102_v11, %v1527_v13 }
0x17c2   :  { %1531 = vrot.lane.b32.xlu0 %v1529_v15, %s3264_s3 }
0x1834   :  { %v1532_v17 = vpop.permute.xlu0 %1531 }
0x1835   :  { %v1534_v18 = vadd.f32 %v1532_v17, %v1524_v16 }
0x1837   :  { %3103 = vtanh.f32 %v1534_v18  ;;  %v1628_v36 = vrot.slane %v1534_v18, 6 }
0x1841   :  { %v3104_v19 = vpop.eup %3103 }
0x1842   :  { %1537 = vrot.lane.b32.xlu1 %v3104_v19, %s3263_s13 }
0x18b4   :  { %v1538_v23 = vpop.permute.xlu1 %1537 }
0x18b5   :  { %v1540_v20 = vmul.f32 %v3102_v11, %v1538_v23 }
0x18b7   :  { %1542 = vrot.lane.b32.xlu0 %v1540_v20, %s3264_s3 }
0x1929   :  { %v1543_v22 = vpop.permute.xlu0 %1542 }
0x192a   :  { %2751 = vmatmul.mubr.msk.f32.vlgmr.msra.gmra.mrb[10].mxu1 %vm93_vm1, %v1543_v22 }
0x192b   :  { %2921 = vmatpush3.bf16.msra.mxu1 %v3573_v32  ;;  %2772 = vmatprep.mubr.msk.f32.mxu1 %vm3261_vm0, %v3262_v1 }
0x192c   :  { %2922 = vmatprep.subr.bf16.mxu1 %v3260_v0 }
0x192f   :  { %2924 = vmatpush3.bf16.msra.mxu1 %v3576_v56 }
0x1930   :  { %2931 = vmatprep.subr.bf16.mxu1 %v3260_v0 }
0x19fd   :  { %v1612_v24 = vpop.f32.mrb[10].mxu1 }
0x19fe   :  { %v1617_v25 = vrot.slane %v1612_v24, 6  ;;  %v2752_v26 = vpop.f32.mrb[11].mxu1 }
0x1a00   :  { %v1619_v27 = vadd.f32 %v1617_v25, %v3604_v4 }
0x1a02   :  { %3105 = vtanh.f32 %v1619_v27  ;;  %v2504_v29 = vmul.f32 -1.442695, %v1619_v27 }
0x1a04   :  { %3107 = vpow2.f32 %v2504_v29 }
0x1a0c   :  { %v3106_v28 = vpop.eup %3105 }
0x1a0d   :  { %1632 = vrot.lane.b32.xlu1 %v3106_v28, %s3263_s13 }
0x1a0e   :  { %v3108_v30 = vpop.eup %3107 }
0x1a0f   :  { %v1623_v31 = vadd.f32 1.0, %v3108_v30 }
0x1a11   :  { %3109 = vrcp.f32 %v1623_v31 }
0x1a1b   :  { %v3110_v33 = vpop.eup %3109 }
0x1a1c   :  { %v1630_v37 = vmul.f32 %v3110_v33, %v1628_v36 }
0x1a7f   :  { %v1633_v34 = vpop.permute.xlu1 %1632 }
0x1a80   :  { %v1635_v35 = vmul.f32 %v3110_v33, %v1633_v34 }
0x1a82   :  { %1637 = vrot.lane.b32.xlu0 %v1635_v35, %s3264_s3 }
0x1af4   :  { %v1638_v38 = vpop.permute.xlu0 %1637 }
0x1af5   :  { %v1640_v39 = vadd.f32 %v1638_v38, %v1630_v37 }
0x1af7   :  { %3111 = vtanh.f32 %v1640_v39  ;;  %v1735_v52 = vrot.slane %v1640_v39, 6 }
0x1b01   :  { %v3112_v41 = vpop.eup %3111 }
0x1b02   :  { %1643 = vrot.lane.b32.xlu1 %v3112_v41, %s3263_s13 }
0x1b74   :  { %v1644_v42 = vpop.permute.xlu1 %1643 }
0x1b75   :  { %v1646_v12 = vmul.f32 %v3110_v33, %v1644_v42 }
0x1b77   :  { %v1648_v43 = vrot.slane %v1646_v12, 2 }
0x1b79   :  { %1649 = vrot.lane.b32.xlu0 %v1648_v43, %s3264_s3 }
0x1beb   :  { %v1650_v44 = vpop.permute.xlu0 %1649 }
0x1bec   :  { %2762 = vmatmul.mubr.msk.f32.vlgmr.msra.gmra.mrb[12].mxu0 %vm93_vm1, %v1650_v44 }
0x1bed   :  { %2927 = vmatpush3.bf16.msra.mxu0 %v3573_v32  ;;  %2783 = vmatprep.mubr.msk.f32.mxu0 %vm3261_vm0, %v3262_v1 }
0x1bee   :  { %2928 = vmatprep.subr.bf16.mxu0 %v3260_v0 }
0x1bf1   :  { %2930 = vmatpush3.bf16.msra.mxu0 %v3576_v56 }
0x1bf2   :  { %2937 = vmatprep.subr.bf16.mxu0 %v3260_v0 }
0x1cbf   :  { %v1719_v40 = vpop.f32.mrb[12].mxu0 }
0x1cc0   :  { %v1724_v45 = vrot.slane %v1719_v40, 4  ;;  %v2763_v46 = vpop.f32.mrb[13].mxu0 }
0x1cc2   :  { %v1726_v21 = vadd.f32 %v1724_v45, %v3604_v4 }
0x1cc4   :  { %3113 = vtanh.f32 %v1726_v21  ;;  %v2506_v9 = vmul.f32 -1.442695, %v1726_v21 }
0x1cc6   :  { %3115 = vpow2.f32 %v2506_v9 }
0x1cce   :  { %v3114_v47 = vpop.eup %3113 }
0x1ccf   :  { %1739 = vrot.lane.b32.xlu1 %v3114_v47, %s3263_s13 }
0x1cd0   :  { %v3116_v48 = vpop.eup %3115 }
0x1cd1   :  { %v1730_v49 = vadd.f32 1.0, %v3116_v48 }
0x1cd3   :  { %3117 = vrcp.f32 %v1730_v49 }
0x1cdd   :  { %v3118_v14 = vpop.eup %3117 }
0x1cde   :  { %v1737_v53 = vmul.f32 %v3118_v14, %v1735_v52 }
0x1d41   :  { %v1740_v50 = vpop.permute.xlu1 %1739 }
0x1d42   :  { %v1742_v51 = vmul.f32 %v3118_v14, %v1740_v50 }
0x1d44   :  { %1744 = vrot.lane.b32.xlu0 %v1742_v51, %s3264_s3 }
0x1db6   :  { %v1745_v54 = vpop.permute.xlu0 %1744 }
0x1db7   :  { %v1747_v55 = vadd.f32 %v1745_v54, %v1737_v53 }
0x1db9   :  { %3119 = vtanh.f32 %v1747_v55  ;;  %v1842_v16 = vrot.slane %v1747_v55, 6 }
0x1dc3   :  { %v3120_v57 = vpop.eup %3119 }
0x1dc4   :  { %1750 = vrot.lane.b32.xlu1 %v3120_v57, %s3263_s13 }
0x1e36   :  { %v1751_v58 = vpop.permute.xlu1 %1750 }
0x1e37   :  { %v1753_v59 = vmul.f32 %v3118_v14, %v1751_v58 }
0x1e39   :  { %v1755_v60 = vrot.slane %v1753_v59, 4 }
0x1e3b   :  { %1756 = vrot.lane.b32.xlu0 %v1755_v60, %s3264_s3 }
0x1ead   :  { %v1757_v61 = vpop.permute.xlu0 %1756 }
0x1eae   :  { %2773 = vmatmul.mubr.msk.f32.vlgmr.msra.gmra.mrb[12].mxu1 %vm93_vm1, %v1757_v61 }
0x1eaf   :  { %2933 = vmatpush3.bf16.msra.mxu1 %v3573_v32  ;;  %2794 = vmatprep.mubr.msk.f32.mxu1 %vm3261_vm0, %v3262_v1 }
0x1eb0   :  { %2934 = vmatprep.subr.bf16.mxu1 %v3260_v0 }
0x1eb3   :  { %2936 = vmatpush3.bf16.msra.mxu1 %v3576_v56 }
0x1eb4   :  { %2943 = vmatprep.subr.bf16.mxu1 %v3260_v0 }
0x1f81   :  { %v1826_v62 = vpop.f32.mrb[12].mxu1 }
0x1f82   :  { %v1831_v63 = vrot.slane %v1826_v62, 2  ;;  %v2774_v3 = vpop.f32.mrb[13].mxu1 }
0x1f84   :  { %v1833_v5 = vadd.f32 %v1831_v63, %v3604_v4 }
0x1f86   :  { %3121 = vtanh.f32 %v1833_v5  ;;  %v2508_v7 = vmul.f32 -1.442695, %v1833_v5 }
0x1f88   :  { %3123 = vpow2.f32 %v2508_v7 }
0x1f90   :  { %v3122_v6 = vpop.eup %3121 }
0x1f91   :  { %1846 = vrot.lane.b32.xlu1 %v3122_v6, %s3263_s13 }
0x1f92   :  { %v3124_v8 = vpop.eup %3123 }
0x1f93   :  { %v1837_v10 = vadd.f32 1.0, %v3124_v8 }
0x1f95   :  { %3125 = vrcp.f32 %v1837_v10 }
0x1f9f   :  { %v3126_v11 = vpop.eup %3125 }
0x1fa0   :  { %v1844_v17 = vmul.f32 %v3126_v11, %v1842_v16 }
0x2003   :  { %v1847_v13 = vpop.permute.xlu1 %1846 }
0x2004   :  { %v1849_v15 = vmul.f32 %v3126_v11, %v1847_v13 }
0x2006   :  { %1851 = vrot.lane.b32.xlu0 %v1849_v15, %s3264_s3 }
0x2078   :  { %v1852_v18 = vpop.permute.xlu0 %1851 }
0x2079   :  { %v1854_v19 = vadd.f32 %v1852_v18, %v1844_v17 }
0x207b   :  { %3127 = vtanh.f32 %v1854_v19  ;;  %v1946_v36 = vrot.slane %v1854_v19, 6 }
0x2085   :  { %v3128_v4 = vpop.eup %3127 }
0x2086   :  { %1857 = vrot.lane.b32.xlu1 %v3128_v4, %s3263_s13 }
0x20f8   :  { %v1858_v23 = vpop.permute.xlu1 %1857 }
0x20f9   :  { %v1860_v20 = vmul.f32 %v3126_v11, %v1858_v23 }
0x20fb   :  { %v1862_v22 = vrot.slane %v1860_v20, 6 }
0x20fd   :  { %1863 = vrot.lane.b32.xlu0 %v1862_v22, %s3264_s3 }
0x216f   :  { %v1864_v24 = vpop.permute.xlu0 %1863 }
0x2170   :  { %2784 = vmatmul.mubr.msk.f32.vlgmr.msra.gmra.mrb[14].mxu0 %vm93_vm1, %v1864_v24 }
0x2171   :  { %2939 = vmatpush3.bf16.msra.mxu0 %v3573_v32  ;;  %2805 = vmatprep.mubr.msk.f32.mxu0 %vm3261_vm0, %v3262_v1 }
0x2172   :  { %2940 = vmatprep.subr.bf16.mxu0 %v3260_v0 }
0x2175   :  { %2942 = vmatpush3.bf16.msra.mxu0 %v3576_v56 }
0x2176   :  { %2949 = vmatprep.subr.bf16.mxu0 %v3260_v0 }
0x2243   :  { %v1933_v25 = vpop.f32.mrb[14].mxu0 }
0x2244   :  { %v1937_v26 = vadd.f32 %v1933_v25, %v3602_v2  ;;  %v2785_v27 = vpop.f32.mrb[15].mxu0 }
0x2246   :  { %3129 = vtanh.f32 %v1937_v26  ;;  %v2510_v29 = vmul.f32 -1.442695, %v1937_v26 }
0x2248   :  { %3131 = vpow2.f32 %v2510_v29 }
0x2250   :  { %v3130_v28 = vpop.eup %3129 }
0x2251   :  { %1950 = vrot.lane.b32.xlu1 %v3130_v28, %s3263_s13 }
0x2252   :  { %v3132_v30 = vpop.eup %3131 }
0x2253   :  { %v1941_v31 = vadd.f32 1.0, %v3132_v30 }
0x2255   :  { %3133 = vrcp.f32 %v1941_v31 }
0x225f   :  { %v3134_v33 = vpop.eup %3133 }
0x2260   :  { %v1948_v37 = vmul.f32 %v3134_v33, %v1946_v36 }
0x22c3   :  { %v1951_v34 = vpop.permute.xlu1 %1950 }
0x22c4   :  { %v1953_v35 = vmul.f32 %v3134_v33, %v1951_v34 }
0x22c6   :  { %1955 = vrot.lane.b32.xlu0 %v1953_v35, %s3264_s3 }
0x2338   :  { %v1956_v38 = vpop.permute.xlu0 %1955 }
0x2339   :  { %v1958_v39 = vadd.f32 %v1956_v38, %v1948_v37  ;;  %v2286_v37 = vld [vmem:[%s3732_s7 + $0x8] sm:$0xff]  ;;  %v2287_v38 = vld [vmem:[%s3732_s7 + $0x10] sm:$0xff] }
0x233b   :  { %3135 = vtanh.f32 %v1958_v39 }
0x2345   :  { %v3136_v41 = vpop.eup %3135 }
0x2346   :  { %1961 = vrot.lane.b32.xlu1 %v3136_v41, %s3263_s13  ;;  %v2288_v41 = vld [vmem:[%s3732_s7 + $0x18] sm:$0xff] }
0x23b8   :  { %v1962_v42 = vpop.permute.xlu1 %1961 }
0x23b9   :  { %v1964_v12 = vmul.f32 %v3134_v33, %v1962_v42  ;;  %v2953_v42 = vpack.c.bf16 %v2288_v41, %v2287_v38 }
0x23bb   :  { %1966 = vrot.lane.b32.xlu0 %v1964_v12, %s3264_s3 }
0x242d   :  { %v1967_v43 = vpop.permute.xlu0 %1966 }
0x242e   :  { %2795 = vmatmul.mubr.msk.f32.vlgmr.msra.gmra.mrb[14].mxu1 %vm93_vm1, %v1967_v43  ;;  %v2372_v43 = vld [vmem:[%s3734_s9] sm:$0xff] }
0x242f   :  { %2945 = vmatpush3.bf16.msra.mxu1 %v3573_v32  ;;  %2816 = vmatprep.mubr.msk.f32.mxu1 %vm3261_vm0, %v3262_v1 }
0x2430   :  { %2946 = vmatprep.subr.bf16.mxu1 %v3260_v0 }
0x2433   :  { %2948 = vmatpush3.bf16.msra.mxu1 %v3576_v56  ;;  %v2052_v56 = vrot.slane %v1958_v39, 6 }
0x2434   :  { %2955 = vmatprep.subr.bf16.mxu1 %v3260_v0 }
0x2501   :  { %v2036_v44 = vpop.f32.mrb[14].mxu1 }
0x2502   :  { %v2041_v40 = vrot.slane %v2036_v44, 6  ;;  %v2796_v45 = vpop.f32.mrb[15].mxu1  ;;  %v2373_v44 = vld [vmem:[%s3734_s9 + $0x8] sm:$0xff] }
0x2504   :  { %v2043_v46 = vadd.f32 %v2041_v40, %v3602_v2  ;;  %v2956_v40 = vpack.c.bf16 %v2373_v44, %v2372_v43 }
0x2506   :  { %3137 = vtanh.f32 %v2043_v46  ;;  %v2512_v47 = vmul.f32 -1.442695, %v2043_v46 }
0x2508   :  { %3139 = vpow2.f32 %v2512_v47  ;;  %v2517_v47 = vld [vmem:[%s3733_s8] ss:$0 sm:$0xff] }
0x2510   :  { %v3138_v21 = vpop.eup %3137 }
0x2511   :  { %2056 = vrot.lane.b32.xlu1 %v3138_v21, %s3263_s13 }
0x2512   :  { %v3140_v32 = vpop.eup %3139 }
0x2513   :  { %v2047_v9 = vadd.f32 1.0, %v3140_v32 }
0x2515   :  { %3141 = vrcp.f32 %v2047_v9 }
0x251f   :  { %v3142_v48 = vpop.eup %3141 }
0x2520   :  { %v2054_v50 = vmul.f32 %v3142_v48, %v2052_v56 }
0x2583   :  { %v2057_v49 = vpop.permute.xlu1 %2056 }
0x2584   :  { %v2059_v14 = vmul.f32 %v3142_v48, %v2057_v49  ;;  %v2519_v49 = vld [vmem:[%s3735_s10] ss:$0 sm:$0xff] }
0x2586   :  { %2061 = vrot.lane.b32.xlu0 %v2059_v14, %s3264_s3 }
0x25f8   :  { %v2062_v51 = vpop.permute.xlu0 %2061 }
0x25f9   :  { %v2064_v52 = vadd.f32 %v2062_v51, %v2054_v50 }
0x25fb   :  { %3143 = vtanh.f32 %v2064_v52  ;;  %v2159_v11 = vrot.slane %v2064_v52, 6 }
0x2605   :  { %v3144_v53 = vpop.eup %3143 }
0x2606   :  { %2067 = vrot.lane.b32.xlu1 %v3144_v53, %s3263_s13 }
0x2678   :  { %v2068_v54 = vpop.permute.xlu1 %2067 }
0x2679   :  { %v2070_v55 = vmul.f32 %v3142_v48, %v2068_v54 }
0x267b   :  { %v2072_v57 = vrot.slane %v2070_v55, 2 }
0x267d   :  { %2073 = vrot.lane.b32.xlu0 %v2072_v57, %s3264_s3 }
0x26ef   :  { %v2074_v58 = vpop.permute.xlu0 %2073 }
0x26f0   :  { %2806 = vmatmul.mubr.msk.f32.vlgmr.msra.gmra.mrb[16].mxu0 %vm93_vm1, %v2074_v58 }
0x26f1   :  { %2827 = vmatprep.mubr.msk.f32.mxu0 %vm3261_vm0, %v3262_v1 }
0x27c3   :  { %v2143_v59 = vpop.f32.mrb[16].mxu0 }
0x27c4   :  { %v2148_v60 = vrot.slane %v2143_v59, 4  ;;  %v2807_v61 = vpop.f32.mrb[17].mxu0 }
0x27c6   :  { %v2150_v62 = vadd.f32 %v2148_v60, %v3602_v2 }
0x27c8   :  { %3145 = vtanh.f32 %v2150_v62  ;;  %v2514_v3 = vmul.f32 -1.442695, %v2150_v62 }
0x27ca   :  { %3147 = vpow2.f32 %v2514_v3 }
0x27d2   :  { %v3146_v63 = vpop.eup %3145 }
0x27d3   :  { %2163 = vrot.lane.b32.xlu1 %v3146_v63, %s3263_s13 }
0x27d4   :  { %v3148_v5 = vpop.eup %3147 }
0x27d5   :  { %v2154_v6 = vadd.f32 1.0, %v3148_v5 }
0x27d7   :  { %3149 = vrcp.f32 %v2154_v6 }
0x27e1   :  { %v3150_v7 = vpop.eup %3149 }
0x27e2   :  { %v2161_v13 = vmul.f32 %v3150_v7, %v2159_v11 }
0x2845   :  { %v2164_v8 = vpop.permute.xlu1 %2163 }
0x2846   :  { %v2166_v10 = vmul.f32 %v3150_v7, %v2164_v8 }
0x2848   :  { %2168 = vrot.lane.b32.xlu0 %v2166_v10, %s3264_s3 }
0x28ba   :  { %v2169_v15 = vpop.permute.xlu0 %2168 }
0x28bb   :  { %v2171_v16 = vadd.f32 %v2169_v15, %v2161_v13 }
0x28bd   :  { %3151 = vtanh.f32 %v2171_v16 }
0x28c7   :  { %v3152_v17 = vpop.eup %3151 }
0x28c8   :  { %2174 = vrot.lane.b32.xlu1 %v3152_v17, %s3263_s13 }
0x293a   :  { %v2175_v18 = vpop.permute.xlu1 %2174 }
0x293b   :  { %v2177_v19 = vmul.f32 %v3150_v7, %v2175_v18 }
0x293d   :  { %v2179_v4 = vrot.slane %v2177_v19, 4 }
0x293f   :  { %2180 = vrot.lane.b32.xlu0 %v2179_v4, %s3264_s3 }
0x29b1   :  { %v2181_v23 = vpop.permute.xlu0 %2180 }
0x29b2   :  { %2817 = vmatmul.mubr.msk.f32.vlgmr.msra.gmra.mrb[16].mxu1 %vm93_vm1, %v2181_v23 }
0x29b3   :  { %2834 = vmatprep.mubr.msk.f32.mxu1 %vm3261_vm0, %v3262_v1  ;;  %v2266_v1 = vrot.slane %v2171_v16, 6  ;;  %2957 = vmatpush3.bf16.msra.mxu1 %v2956_v40  ;;  %vm2381_vm0 = vcmask 130048  }
0x2a85   :  { %v2250_v20 = vpop.f32.mrb[16].mxu1 }
0x2a86   :  { %v2255_v22 = vrot.slane %v2250_v20, 2  ;;  %v2818_v24 = vpop.f32.mrb[17].mxu1 }
0x2a88   :  { %v2257_v25 = vadd.f32 %v2255_v22, %v3602_v2  ;;  %v2285_v2 = vld [vmem:[%s3732_s7] sm:$0xff] }
0x2a89   :  { %v2950_v39 = vpack.c.bf16 %v2286_v37, %v2285_v2 }
0x2a8a   :  { %3153 = vtanh.f32 %v2257_v25  ;;  %v2516_v27 = vmul.f32 -1.442695, %v2257_v25 }
0x2a8b   :  { %2951 = vmatpush3.bf16.msra.mxu0 %v2950_v39 }
0x2a8c   :  { %3155 = vpow2.f32 %v2516_v27  ;;  %2952 = vmatprep.subr.bf16.mxu0 %v3260_v0 }
0x2a8f   :  { %2954 = vmatpush3.bf16.msra.mxu0 %v2953_v42 }
0x2a94   :  { %v3154_v26 = vpop.eup %3153 }
0x2a95   :  { %2270 = vrot.lane.b32.xlu1 %v3154_v26, %s3263_s13 }
0x2a96   :  { %v3156_v28 = vpop.eup %3155 }
0x2a97   :  { %v2261_v29 = vadd.f32 1.0, %v3156_v28 }
0x2a99   :  { %3157 = vrcp.f32 %v2261_v29 }
0x2aa3   :  { %v3158_v30 = vpop.eup %3157 }
0x2aa4   :  { %v2268_v34 = vmul.f32 %v3158_v30, %v2266_v1 }
0x2b07   :  { %v2271_v31 = vpop.permute.xlu1 %2270 }
0x2b08   :  { %v2273_v33 = vmul.f32 %v3158_v30, %v2271_v31 }
0x2b0a   :  { %2275 = vrot.lane.b32.xlu0 %v2273_v33, %s3264_s3 }
0x2b7c   :  { %v2276_v35 = vpop.permute.xlu0 %2275 }
0x2b7d   :  { %v2278_v36 = vadd.f32 %v2276_v35, %v2268_v34 }
0x2b7f   :  { %3159 = vtanh.f32 %v2278_v36 }
0x2b89   :  { %v3160_v12 = vpop.eup %3159 }
0x2b8a   :  { %2281 = vrot.lane.b32.xlu1 %v3160_v12, %s3263_s13 }
0x2bfc   :  { %v2282_v45 = vpop.permute.xlu1 %2281 }
0x2bfd   :  { %v2284_v46 = vmul.f32 %v3158_v30, %v2282_v45 }
0x2bff   :  { %v2297_v21 = vrot.slane %v2284_v46, 6 }
0x2c01   :  { %2298 = vrot.lane.b32.xlu0 %v2297_v21, %s3264_s3 }
0x2c73   :  { %v2299_v0 = vpop.permute.xlu0 %2298 }
0x2c74   :  { %2828 = vmatmul.mubr.msk.f32.vlgmr.msra.gmra.mrb[18].mxu0 %vm93_vm1, %v2299_v0 }
0x2d47   :  { %v2368_v32 = vpop.f32.mrb[18].mxu0 }
0x2d48   :  { %v2369_v9 = vadd.f32 %v2517_v47, %v2368_v32  ;;  %v2829_v48 = vpop.f32.mrb[19].mxu0 }
0x2d4a   :  { %2835 = vmatmul.mubr.msk.f32.vlgmr.msra.gmra.mrb[18].mxu1 %vm2381_vm0, %v2369_v9 }
0x2e1d   :  { %v2451_v14 = vpop.f32.mrb[18].mxu1 }
0x2e1e   :  { %v2452_v56 = vadd.f32 %v2519_v49, %v2451_v14  ;;  %v2836_v50 = vpop.f32.mrb[19].mxu1 }
0x2e20   :  { %2456 = vst.msk [vmem:[#allocation9] sm:$0x3] %vm2455_vm4, %v2452_v56 }
0x2e21   :  { %3238 = shalt.err (!%p3235_p0)
}
0x2e22   :  { %s3239_s28 = scalar_lea.hbm %s3736_s11, 32 }
0x2e23   :  { %p3240_p1 = scmp.ne.s32.totalorder %s3736_s11, %s3239_s28  ;;  %p3243_p2 = scmp.lt.u32.totalorder %s3239_s28, %s3736_s11 }
0x2e25   :  { %p3245_p3 = pnand %p3243_p2, %p3240_p1 }
0x2e27   :  { %3248 = shalt.err (!%p3245_p3)
}
0x2e28   :  { %2466 = dma.vmem_to_hbm [thread:$0]  %s2464_s25, 32, %s3736_s11, [#allocation5]  }
0x2e29   :  { %3253 = dma.done.wait [#allocation5], 32  }
0x2e2a   :  { %3254 = vsyncadd [#allocation5], 4294967264 }
0x2e2b   :  { %2470 = vsyncpa [#allocation4], 1 }
0x2e2c   :  { %2471 = vsyncpa [#allocation7], 1 }
0x2e2d   :  { %2472 = vsyncpa [#allocation5], 1 }

</bundles_post_ra>
